<compile_context>
chip_gen: v7x
topology: tpu7x:2x2x1
jax: 0.10.0
libtpu: 0.0.40
codegen_flags: <defaults>
</compile_context>

<pallas_src>
import functools
import math

import jax
import jax.numpy as jnp
from jax import lax
from jax.experimental import pallas as pl
from jax.experimental.pallas import tpu as pltpu

# ----------------------------- model config (small) ------------------------
VOCAB = 100
PAD_IDX = 1
MAX_POS = 64
HIDDEN = 32          # phobert hidden_size (768 in the real model)
N_HEADS = 4
HEAD_DIM = HIDDEN // N_HEADS
INTERMEDIATE = 64
N_LAYERS = 2
FC_HIDDEN = 64       # nn.Linear(hidden_size=64) in the module
NUM_CLASSES = 3
OUT_PAD = 128        # lane-dense padded width for the classifier output
LN_EPS = 1e-5


# ----------------------------- in-kernel helpers ----------------------------
def _layernorm(x, g, b):
    mean = jnp.mean(x, axis=-1, keepdims=True)
    xc = x - mean
    var = jnp.mean(xc * xc, axis=-1, keepdims=True)
    return xc * lax.rsqrt(var + LN_EPS) * g + b


def _gelu(x):
    # TODO(synk): HF RoBERTa (PhoBERT) uses exact erf GELU; tanh approximation here.
    c = math.sqrt(2.0 / math.pi)
    return 0.5 * x * (1.0 + jnp.tanh(c * (x + 0.044715 * x * x * x)))


# ----------------------------- the fused kernel -----------------------------
def _model_kernel(ids_ref, pos_ref, bias_ref,
                  word_emb_ref, pos_emb_ref, type_emb_ref,
                  emb_g_ref, emb_b_ref,
                  qkv_w_ref, qkv_b_ref, ao_w_ref, ao_b_ref,
                  ln1_g_ref, ln1_b_ref, ff1_w_ref, ff1_b_ref,
                  ff2_w_ref, ff2_b_ref, ln2_g_ref, ln2_b_ref,
                  fc_w_ref, fc_b_ref, out_w_ref, out_b_ref,
                  logits_ref, *, batch, seq, batch_pad):
    """Whole model in one invocation: embeddings + N_LAYERS encoder + head."""
    bs = batch * seq
    scale = 1.0 / math.sqrt(HEAD_DIM)

    # ---- embeddings: fused one-hot gathers (two tiny MXU matmuls) ----------
    ids = ids_ref[...]                                         # (B*S, 1) int32
    pos = pos_ref[...]                                         # (B*S, 1) int32
    voc_iota = lax.broadcasted_iota(jnp.int32, (bs, VOCAB), 1)
    pos_iota = lax.broadcasted_iota(jnp.int32, (bs, MAX_POS), 1)
    oh_word = (ids == voc_iota).astype(jnp.float32)            # (B*S, VOCAB)
    oh_pos = (pos == pos_iota).astype(jnp.float32)             # (B*S, MAX_POS)
    h = (jnp.dot(oh_word, word_emb_ref[...], preferred_element_type=jnp.float32)
         + jnp.dot(oh_pos, pos_emb_ref[...], preferred_element_type=jnp.float32)
         + type_emb_ref[0:1, :])                               # token_type_ids == 0
    h = _layernorm(h, emb_g_ref[...], emb_b_ref[...])          # (B*S, H)

    # Block-diagonal additive attention bias (padding + cross-batch -> -1e9).
    bias = bias_ref[...]                                       # (B*S, B*S)

    # Hoisted per-head lane masks: heads stay folded in lanes (no transposes).
    col = lax.broadcasted_iota(jnp.int32, (1, HIDDEN), 1)
    head_masks = [((col >= hd * HEAD_DIM) & (col < (hd + 1) * HEAD_DIM))
                  .astype(jnp.float32) for hd in range(N_HEADS)]

    # ---- encoder: static layer loop, all weights VMEM-resident -------------
    for l in range(N_LAYERS):
        x = h
        # Fused QKV projection: one [B*S, H] @ [H, 3H] matmul.
        qkv = (jnp.dot(x, qkv_w_ref[l], preferred_element_type=jnp.float32)
               + qkv_b_ref[l])
        q = qkv[:, 0 * HIDDEN:1 * HIDDEN]
        k = qkv[:, 1 * HIDDEN:2 * HIDDEN]
        v = qkv[:, 2 * HIDDEN:3 * HIDDEN]

        ctx = jnp.zeros((bs, HIDDEN), jnp.float32)
        for hm in head_masks:                                  # static unroll
            # (q masked to this head) . k == q_h @ k_h^T, one matmul over ALL rows;
            # the block-diagonal bias kills cross-batch scores in the softmax.
            s = lax.dot_general(q * hm, k, (((1,), (1,)), ((), ())),
                                preferred_element_type=jnp.float32) * scale
            s = s + bias
            s = s - jnp.max(s, axis=-1, keepdims=True)
            p = jnp.exp(s)
            p = p * pl.reciprocal(jnp.sum(p, axis=-1, keepdims=True), approx=True)
            # p @ (v masked to this head) fills exactly this head's output columns.
            ctx = ctx + jnp.dot(p, v * hm, preferred_element_type=jnp.float32)

        # Attention output projection + fused residual + LayerNorm.
        attn_out = (jnp.dot(ctx, ao_w_ref[l], preferred_element_type=jnp.float32)
                    + ao_b_ref[l])
        h1 = _layernorm(attn_out + x, ln1_g_ref[l], ln1_b_ref[l])

        # Fused FFN (linear -> GELU -> linear) + residual + LayerNorm.
        ff = (jnp.dot(h1, ff1_w_ref[l], preferred_element_type=jnp.float32)
              + ff1_b_ref[l])
        ff = _gelu(ff)
        ff = (jnp.dot(ff, ff2_w_ref[l], preferred_element_type=jnp.float32)
              + ff2_b_ref[l])
        h = _layernorm(ff + h1, ln2_g_ref[l], ln2_b_ref[l])

    # ---- CLS-row select (tiny selection matmul) + classification head ------
    row_i = lax.broadcasted_iota(jnp.int32, (batch_pad, bs), 0)
    col_i = lax.broadcasted_iota(jnp.int32, (batch_pad, bs), 1)
    sel = (col_i == row_i * seq).astype(jnp.float32)           # picks rows b*seq
    cls = jnp.dot(sel, h, preferred_element_type=jnp.float32)  # (B_pad, H)
    hid = jnp.maximum(
        jnp.dot(cls, fc_w_ref[...], preferred_element_type=jnp.float32)
        + fc_b_ref[...], 0.0)
    logits_ref[...] = (jnp.dot(hid, out_w_ref[...],
                               preferred_element_type=jnp.float32)
                       + out_b_ref[...])                       # (B_pad, 128) dense


# ----------------------------- parameters -----------------------------------
def init_params(key):
    def nrm(k, shape, scale=0.02):
        return scale * jax.random.normal(k, shape, dtype=jnp.float32)

    keys = iter(jax.random.split(key, 32))
    out_w = nrm(next(keys), (FC_HIDDEN, NUM_CLASSES))
    out_w_pad = jnp.zeros((FC_HIDDEN, OUT_PAD), jnp.float32).at[:, :NUM_CLASSES].set(out_w)

    return {
        "word_emb": nrm(next(keys), (VOCAB, HIDDEN)),
        "pos_emb": nrm(next(keys), (MAX_POS, HIDDEN)),
        "type_emb": nrm(next(keys), (2, HIDDEN)),
        "emb_ln_g": jnp.ones((1, HIDDEN), jnp.float32),
        "emb_ln_b": jnp.zeros((1, HIDDEN), jnp.float32),
        # Layer-stacked encoder weights (leading dim == N_LAYERS), QKV fused.
        "qkv_w": nrm(next(keys), (N_LAYERS, HIDDEN, 3 * HIDDEN)),
        "qkv_b": jnp.zeros((N_LAYERS, 1, 3 * HIDDEN), jnp.float32),
        "ao_w": nrm(next(keys), (N_LAYERS, HIDDEN, HIDDEN)),
        "ao_b": jnp.zeros((N_LAYERS, 1, HIDDEN), jnp.float32),
        "ln1_g": jnp.ones((N_LAYERS, 1, HIDDEN), jnp.float32),
        "ln1_b": jnp.zeros((N_LAYERS, 1, HIDDEN), jnp.float32),
        "ff1_w": nrm(next(keys), (N_LAYERS, HIDDEN, INTERMEDIATE)),
        "ff1_b": jnp.zeros((N_LAYERS, 1, INTERMEDIATE), jnp.float32),
        "ff2_w": nrm(next(keys), (N_LAYERS, INTERMEDIATE, HIDDEN)),
        "ff2_b": jnp.zeros((N_LAYERS, 1, HIDDEN), jnp.float32),
        "ln2_g": jnp.ones((N_LAYERS, 1, HIDDEN), jnp.float32),
        "ln2_b": jnp.zeros((N_LAYERS, 1, HIDDEN), jnp.float32),
        # Classification head (fc: HIDDEN->FC_HIDDEN, output padded to 128 lanes).
        "fc_w": nrm(next(keys), (HIDDEN, FC_HIDDEN)),
        "fc_b": jnp.zeros((1, FC_HIDDEN), jnp.float32),
        "out_w": out_w_pad,
        "out_b": jnp.zeros((1, OUT_PAD), jnp.float32),
    }


# ----------------------------- forward pass ---------------------------------
@jax.jit
def sentiment_forward(params, input_ids, attention_mask):
    """Mirrors SentimentAnalysisModel.forward(input_ids, attention_mask)."""
    B, S = input_ids.shape
    BS = B * S
    B_PAD = ((B + 7) // 8) * 8                                 # sublane-padded rows
    mask_f = attention_mask.astype(jnp.float32)

    # RoBERTa-style position ids (offset by padding_idx), clamped to avoid OOB.
    pos_ids = (jnp.cumsum(mask_f, axis=1) * mask_f).astype(jnp.int32) + PAD_IDX
    pos_ids = jnp.minimum(pos_ids, MAX_POS - 1)

    ids_col = input_ids.reshape(BS, 1).astype(jnp.int32)
    pos_col = pos_ids.reshape(BS, 1)

    # Block-diagonal additive attention bias: 0 where (same batch AND key valid),
    # else -1e9.  Cross-batch probabilities softmax to ~0, so one big attention
    # matmul over all B*S rows is equivalent to per-batch attention.
    batch_idx = jnp.repeat(jnp.arange(B, dtype=jnp.int32), S)           # (B*S,)
    same = batch_idx[:, None] == batch_idx[None, :]
    key_ok = (attention_mask.reshape(BS) > 0)[None, :]
    attn_bias = jnp.where(same & key_ok, 0.0, -1e9).astype(jnp.float32)  # (BS, BS)

    kernel = functools.partial(_model_kernel, batch=B, seq=S, batch_pad=B_PAD)

    # Single grid-less pallas_call: every input is a whole-array VMEM block
    # (total < 100 KB f32), all layers run inside one kernel invocation.
    logits_pad = pl.pallas_call(
        kernel,
        out_shape=jax.ShapeDtypeStruct((B_PAD, OUT_PAD), jnp.float32),
    )(ids_col, pos_col, attn_bias,
      params["word_emb"], params["pos_emb"], params["type_emb"],
      params["emb_ln_g"], params["emb_ln_b"],
      params["qkv_w"], params["qkv_b"], params["ao_w"], params["ao_b"],
      params["ln1_g"], params["ln1_b"], params["ff1_w"], params["ff1_b"],
      params["ff2_w"], params["ff2_b"], params["ln2_g"], params["ln2_b"],
      params["fc_w"], params["fc_b"], params["out_w"], params["out_b"])

    # Unpad: keep the B real batch rows and the 3 real classes.
    return logits_pad[:B, :NUM_CLASSES]


# ----------------------------- main -----------------------------------------
if __name__ == "__main__":
    key = jax.random.PRNGKey(0)
    pkey, ikey = jax.random.split(key)
    params = init_params(pkey)

    B, S = 2, 8
    input_ids = jax.random.randint(ikey, (B, S), 2, VOCAB, dtype=jnp.int32)
    attention_mask = jnp.array(
        [[1, 1, 1, 1, 1, 1, 1, 1],
         [1, 1, 1, 1, 1, 1, 0, 0]], dtype=jnp.int32)

    logits = sentiment_forward(params, input_ids, attention_mask)
    jax.block_until_ready(logits)
    assert logits.shape == (B, NUM_CLASSES) and logits.dtype == jnp.float32
    assert bool(jnp.all(jnp.isfinite(logits)))
    print("KERNEL_OK")
</pallas_src>

<mosaic_0001>
module attributes {stable_mosaic.version = 11 : i64} {
  func.func @_model_kernel(%arg0: memref<16x1xi32, #tpu.memory_space<vmem>>, %arg1: memref<16x1xi32, #tpu.memory_space<vmem>>, %arg2: memref<16x16xf32, #tpu.memory_space<vmem>>, %arg3: memref<100x32xf32, #tpu.memory_space<vmem>>, %arg4: memref<64x32xf32, #tpu.memory_space<vmem>>, %arg5: memref<2x32xf32, #tpu.memory_space<vmem>>, %arg6: memref<1x32xf32, #tpu.memory_space<vmem>>, %arg7: memref<1x32xf32, #tpu.memory_space<vmem>>, %arg8: memref<2x32x96xf32, #tpu.memory_space<vmem>>, %arg9: memref<2x1x96xf32, #tpu.memory_space<vmem>>, %arg10: memref<2x32x32xf32, #tpu.memory_space<vmem>>, %arg11: memref<2x1x32xf32, #tpu.memory_space<vmem>>, %arg12: memref<2x1x32xf32, #tpu.memory_space<vmem>>, %arg13: memref<2x1x32xf32, #tpu.memory_space<vmem>>, %arg14: memref<2x32x64xf32, #tpu.memory_space<vmem>>, %arg15: memref<2x1x64xf32, #tpu.memory_space<vmem>>, %arg16: memref<2x64x32xf32, #tpu.memory_space<vmem>>, %arg17: memref<2x1x32xf32, #tpu.memory_space<vmem>>, %arg18: memref<2x1x32xf32, #tpu.memory_space<vmem>>, %arg19: memref<2x1x32xf32, #tpu.memory_space<vmem>>, %arg20: memref<32x64xf32, #tpu.memory_space<vmem>>, %arg21: memref<1x64xf32, #tpu.memory_space<vmem>>, %arg22: memref<64x128xf32, #tpu.memory_space<vmem>>, %arg23: memref<1x128xf32, #tpu.memory_space<vmem>>, %arg24: memref<8x128xf32, #tpu.memory_space<vmem>>) attributes {dimension_semantics = [], scalar_prefetch = 0 : i64, scratch_operands = 0 : i64, tpu.core_type = #tpu.core_type<tc>} {
    %c0 = arith.constant 0 : index
    %c0_0 = arith.constant 0 : index
    %0 = vector.load %arg0[%c0, %c0_0] : memref<16x1xi32, #tpu.memory_space<vmem>>, vector<16x1xi32>
    %c0_1 = arith.constant 0 : index
    %c0_2 = arith.constant 0 : index
    %1 = vector.load %arg1[%c0_1, %c0_2] : memref<16x1xi32, #tpu.memory_space<vmem>>, vector<16x1xi32>
    %2 = tpu.iota {dimensions = array<i32: 1>} : vector<16x100xi32>
    %3 = tpu.iota {dimensions = array<i32: 1>} : vector<16x64xi32>
    %4 = vector.broadcast %0 : vector<16x1xi32> to vector<16x100xi32>
    %5 = arith.cmpi eq, %4, %2 : vector<16x100xi32>
    %6 = arith.extui %5 : vector<16x100xi1> to vector<16x100xi32>
    %7 = arith.sitofp %6 : vector<16x100xi32> to vector<16x100xf32>
    %8 = vector.broadcast %1 : vector<16x1xi32> to vector<16x64xi32>
    %9 = arith.cmpi eq, %8, %3 : vector<16x64xi32>
    %10 = arith.extui %9 : vector<16x64xi1> to vector<16x64xi32>
    %11 = arith.sitofp %10 : vector<16x64xi32> to vector<16x64xf32>
    %c0_3 = arith.constant 0 : index
    %c0_4 = arith.constant 0 : index
    %12 = vector.load %arg3[%c0_3, %c0_4] : memref<100x32xf32, #tpu.memory_space<vmem>>, vector<100x32xf32>
    %cst = arith.constant dense<0.000000e+00> : vector<16x32xf32>
    %13 = tpu.matmul %7, %12, %cst {dimension_numbers = #tpu.dot_dimension_numbers<[1], [0], [0], [1], [0, 0, 1, 1], [], []>} : vector<16x100xf32>, vector<100x32xf32>, vector<16x32xf32> -> vector<16x32xf32>
    %c0_5 = arith.constant 0 : index
    %c0_6 = arith.constant 0 : index
    %14 = vector.load %arg4[%c0_5, %c0_6] : memref<64x32xf32, #tpu.memory_space<vmem>>, vector<64x32xf32>
    %cst_7 = arith.constant dense<0.000000e+00> : vector<16x32xf32>
    %15 = tpu.matmul %11, %14, %cst_7 {dimension_numbers = #tpu.dot_dimension_numbers<[1], [0], [0], [1], [0, 0, 1, 1], [], []>} : vector<16x64xf32>, vector<64x32xf32>, vector<16x32xf32> -> vector<16x32xf32>
    %16 = arith.addf %13, %15 : vector<16x32xf32>
    %c0_8 = arith.constant 0 : index
    %c0_9 = arith.constant 0 : index
    %17 = vector.load %arg5[%c0_8, %c0_9] : memref<2x32xf32, #tpu.memory_space<vmem>>, vector<1x32xf32>
    %18 = vector.broadcast %17 : vector<1x32xf32> to vector<16x32xf32>
    %19 = arith.addf %16, %18 : vector<16x32xf32>
    %c0_10 = arith.constant 0 : index
    %c0_11 = arith.constant 0 : index
    %20 = vector.load %arg6[%c0_10, %c0_11] : memref<1x32xf32, #tpu.memory_space<vmem>>, vector<1x32xf32>
    %c0_12 = arith.constant 0 : index
    %c0_13 = arith.constant 0 : index
    %21 = vector.load %arg7[%c0_12, %c0_13] : memref<1x32xf32, #tpu.memory_space<vmem>>, vector<1x32xf32>
    %cst_14 = arith.constant dense<0.000000e+00> : vector<16xf32>
    %22 = vector.multi_reduction <add>, %19, %cst_14 [1] : vector<16x32xf32> to vector<16xf32>
    %23 = vector.shape_cast %22 : vector<16xf32> to vector<16x1xf32>
    %cst_15 = arith.constant 3.200000e+01 : f32
    %24 = vector.broadcast %cst_15 : f32 to vector<16x1xf32>
    %25 = arith.divf %23, %24 : vector<16x1xf32>
    %26 = vector.broadcast %25 : vector<16x1xf32> to vector<16x32xf32>
    %27 = arith.subf %19, %26 : vector<16x32xf32>
    %28 = arith.mulf %27, %27 : vector<16x32xf32>
    %cst_16 = arith.constant dense<0.000000e+00> : vector<16xf32>
    %29 = vector.multi_reduction <add>, %28, %cst_16 [1] : vector<16x32xf32> to vector<16xf32>
    %30 = vector.shape_cast %29 : vector<16xf32> to vector<16x1xf32>
    %cst_17 = arith.constant 3.200000e+01 : f32
    %31 = vector.broadcast %cst_17 : f32 to vector<16x1xf32>
    %32 = arith.divf %30, %31 : vector<16x1xf32>
    %cst_18 = arith.constant 9.99999974E-6 : f32
    %33 = vector.broadcast %cst_18 : f32 to vector<16x1xf32>
    %34 = arith.addf %32, %33 : vector<16x1xf32>
    %35 = math.rsqrt %34 : vector<16x1xf32>
    %36 = vector.broadcast %35 : vector<16x1xf32> to vector<16x32xf32>
    %37 = arith.mulf %27, %36 : vector<16x32xf32>
    %38 = vector.broadcast %20 : vector<1x32xf32> to vector<16x32xf32>
    %39 = arith.mulf %37, %38 : vector<16x32xf32>
    %40 = vector.broadcast %21 : vector<1x32xf32> to vector<16x32xf32>
    %41 = arith.addf %39, %40 : vector<16x32xf32>
    %c0_19 = arith.constant 0 : index
    %c0_20 = arith.constant 0 : index
    %42 = vector.load %arg2[%c0_19, %c0_20] : memref<16x16xf32, #tpu.memory_space<vmem>>, vector<16x16xf32>
    %43 = tpu.iota {dimensions = array<i32: 1>} : vector<1x32xi32>
    %c0_i32 = arith.constant 0 : i32
    %44 = vector.broadcast %c0_i32 : i32 to vector<1x32xi32>
    %45 = arith.cmpi sge, %43, %44 : vector<1x32xi32>
    %c8_i32 = arith.constant 8 : i32
    %46 = vector.broadcast %c8_i32 : i32 to vector<1x32xi32>
    %47 = arith.cmpi slt, %43, %46 : vector<1x32xi32>
    %48 = arith.andi %45, %47 : vector<1x32xi1>
    %49 = arith.extui %48 : vector<1x32xi1> to vector<1x32xi32>
    %50 = arith.sitofp %49 : vector<1x32xi32> to vector<1x32xf32>
    %c8_i32_21 = arith.constant 8 : i32
    %51 = vector.broadcast %c8_i32_21 : i32 to vector<1x32xi32>
    %52 = arith.cmpi sge, %43, %51 : vector<1x32xi32>
    %c16_i32 = arith.constant 16 : i32
    %53 = vector.broadcast %c16_i32 : i32 to vector<1x32xi32>
    %54 = arith.cmpi slt, %43, %53 : vector<1x32xi32>
    %55 = arith.andi %52, %54 : vector<1x32xi1>
    %56 = arith.extui %55 : vector<1x32xi1> to vector<1x32xi32>
    %57 = arith.sitofp %56 : vector<1x32xi32> to vector<1x32xf32>
    %c16_i32_22 = arith.constant 16 : i32
    %58 = vector.broadcast %c16_i32_22 : i32 to vector<1x32xi32>
    %59 = arith.cmpi sge, %43, %58 : vector<1x32xi32>
    %c24_i32 = arith.constant 24 : i32
    %60 = vector.broadcast %c24_i32 : i32 to vector<1x32xi32>
    %61 = arith.cmpi slt, %43, %60 : vector<1x32xi32>
    %62 = arith.andi %59, %61 : vector<1x32xi1>
    %63 = arith.extui %62 : vector<1x32xi1> to vector<1x32xi32>
    %64 = arith.sitofp %63 : vector<1x32xi32> to vector<1x32xf32>
    %c24_i32_23 = arith.constant 24 : i32
    %65 = vector.broadcast %c24_i32_23 : i32 to vector<1x32xi32>
    %66 = arith.cmpi sge, %43, %65 : vector<1x32xi32>
    %c32_i32 = arith.constant 32 : i32
    %67 = vector.broadcast %c32_i32 : i32 to vector<1x32xi32>
    %68 = arith.cmpi slt, %43, %67 : vector<1x32xi32>
    %69 = arith.andi %66, %68 : vector<1x32xi1>
    %70 = arith.extui %69 : vector<1x32xi1> to vector<1x32xi32>
    %71 = arith.sitofp %70 : vector<1x32xi32> to vector<1x32xf32>
    %c0_24 = arith.constant 0 : index
    %c0_25 = arith.constant 0 : index
    %c0_26 = arith.constant 0 : index
    %72 = vector.load %arg8[%c0_24, %c0_25, %c0_26] : memref<2x32x96xf32, #tpu.memory_space<vmem>>, vector<1x32x96xf32>
    %73 = vector.shape_cast %72 : vector<1x32x96xf32> to vector<32x96xf32>
    %cst_27 = arith.constant dense<0.000000e+00> : vector<16x96xf32>
    %74 = tpu.matmul %41, %73, %cst_27 {dimension_numbers = #tpu.dot_dimension_numbers<[1], [0], [0], [1], [0, 0, 1, 1], [], []>} : vector<16x32xf32>, vector<32x96xf32>, vector<16x96xf32> -> vector<16x96xf32>
    %c0_28 = arith.constant 0 : index
    %c0_29 = arith.constant 0 : index
    %c0_30 = arith.constant 0 : index
    %75 = vector.load %arg9[%c0_28, %c0_29, %c0_30] : memref<2x1x96xf32, #tpu.memory_space<vmem>>, vector<1x1x96xf32>
    %76 = vector.shape_cast %75 : vector<1x1x96xf32> to vector<1x96xf32>
    %77 = vector.broadcast %76 : vector<1x96xf32> to vector<16x96xf32>
    %78 = arith.addf %74, %77 : vector<16x96xf32>
    %79 = vector.extract_strided_slice %78 {offsets = [0, 0], sizes = [16, 32], strides = [1, 1]} : vector<16x96xf32> to vector<16x32xf32>
    %80 = vector.extract_strided_slice %78 {offsets = [0, 32], sizes = [16, 32], strides = [1, 1]} : vector<16x96xf32> to vector<16x32xf32>
    %81 = vector.extract_strided_slice %78 {offsets = [0, 64], sizes = [16, 32], strides = [1, 1]} : vector<16x96xf32> to vector<16x32xf32>
    %cst_31 = arith.constant 0.000000e+00 : f32
    %82 = vector.broadcast %cst_31 : f32 to vector<16x32xf32>
    %83 = vector.broadcast %50 : vector<1x32xf32> to vector<16x32xf32>
    %84 = arith.mulf %79, %83 : vector<16x32xf32>
    %cst_32 = arith.constant dense<0.000000e+00> : vector<16x16xf32>
    %85 = tpu.matmul %84, %80, %cst_32 {dimension_numbers = #tpu.dot_dimension_numbers<[1], [1], [0], [0], [0, 0, 1, 0], [], []>} : vector<16x32xf32>, vector<16x32xf32>, vector<16x16xf32> -> vector<16x16xf32>
    %cst_33 = arith.constant 0.353553385 : f32
    %86 = vector.broadcast %cst_33 : f32 to vector<16x16xf32>
    %87 = arith.mulf %85, %86 : vector<16x16xf32>
    %88 = arith.addf %87, %42 : vector<16x16xf32>
    %cst_34 = arith.constant dense<0xFF800000> : vector<16xf32>
    %89 = vector.multi_reduction <maximumf>, %88, %cst_34 [1] : vector<16x16xf32> to vector<16xf32>
    %90 = vector.shape_cast %89 : vector<16xf32> to vector<16x1xf32>
    %91 = vector.broadcast %90 : vector<16x1xf32> to vector<16x16xf32>
    %92 = arith.subf %88, %91 : vector<16x16xf32>
    %93 = math.exp %92 : vector<16x16xf32>
    %cst_35 = arith.constant dense<0.000000e+00> : vector<16xf32>
    %94 = vector.multi_reduction <add>, %93, %cst_35 [1] : vector<16x16xf32> to vector<16xf32>
    %95 = vector.shape_cast %94 : vector<16xf32> to vector<16x1xf32>
    %96 = tpu.reciprocal %95 {approx = true} : vector<16x1xf32> -> vector<16x1xf32>
    %97 = vector.broadcast %96 : vector<16x1xf32> to vector<16x16xf32>
    %98 = arith.mulf %93, %97 : vector<16x16xf32>
    %99 = vector.broadcast %50 : vector<1x32xf32> to vector<16x32xf32>
    %100 = arith.mulf %81, %99 : vector<16x32xf32>
    %cst_36 = arith.constant dense<0.000000e+00> : vector<16x32xf32>
    %101 = tpu.matmul %98, %100, %cst_36 {dimension_numbers = #tpu.dot_dimension_numbers<[1], [0], [0], [1], [0, 0, 1, 1], [], []>} : vector<16x16xf32>, vector<16x32xf32>, vector<16x32xf32> -> vector<16x32xf32>
    %102 = arith.addf %82, %101 : vector<16x32xf32>
    %103 = vector.broadcast %57 : vector<1x32xf32> to vector<16x32xf32>
    %104 = arith.mulf %79, %103 : vector<16x32xf32>
    %cst_37 = arith.constant dense<0.000000e+00> : vector<16x16xf32>
    %105 = tpu.matmul %104, %80, %cst_37 {dimension_numbers = #tpu.dot_dimension_numbers<[1], [1], [0], [0], [0, 0, 1, 0], [], []>} : vector<16x32xf32>, vector<16x32xf32>, vector<16x16xf32> -> vector<16x16xf32>
    %cst_38 = arith.constant 0.353553385 : f32
    %106 = vector.broadcast %cst_38 : f32 to vector<16x16xf32>
    %107 = arith.mulf %105, %106 : vector<16x16xf32>
    %108 = arith.addf %107, %42 : vector<16x16xf32>
    %cst_39 = arith.constant dense<0xFF800000> : vector<16xf32>
    %109 = vector.multi_reduction <maximumf>, %108, %cst_39 [1] : vector<16x16xf32> to vector<16xf32>
    %110 = vector.shape_cast %109 : vector<16xf32> to vector<16x1xf32>
    %111 = vector.broadcast %110 : vector<16x1xf32> to vector<16x16xf32>
    %112 = arith.subf %108, %111 : vector<16x16xf32>
    %113 = math.exp %112 : vector<16x16xf32>
    %cst_40 = arith.constant dense<0.000000e+00> : vector<16xf32>
    %114 = vector.multi_reduction <add>, %113, %cst_40 [1] : vector<16x16xf32> to vector<16xf32>
    %115 = vector.shape_cast %114 : vector<16xf32> to vector<16x1xf32>
    %116 = tpu.reciprocal %115 {approx = true} : vector<16x1xf32> -> vector<16x1xf32>
    %117 = vector.broadcast %116 : vector<16x1xf32> to vector<16x16xf32>
    %118 = arith.mulf %113, %117 : vector<16x16xf32>
    %119 = vector.broadcast %57 : vector<1x32xf32> to vector<16x32xf32>
    %120 = arith.mulf %81, %119 : vector<16x32xf32>
    %cst_41 = arith.constant dense<0.000000e+00> : vector<16x32xf32>
    %121 = tpu.matmul %118, %120, %cst_41 {dimension_numbers = #tpu.dot_dimension_numbers<[1], [0], [0], [1], [0, 0, 1, 1], [], []>} : vector<16x16xf32>, vector<16x32xf32>, vector<16x32xf32> -> vector<16x32xf32>
    %122 = arith.addf %102, %121 : vector<16x32xf32>
    %123 = vector.broadcast %64 : vector<1x32xf32> to vector<16x32xf32>
    %124 = arith.mulf %79, %123 : vector<16x32xf32>
    %cst_42 = arith.constant dense<0.000000e+00> : vector<16x16xf32>
    %125 = tpu.matmul %124, %80, %cst_42 {dimension_numbers = #tpu.dot_dimension_numbers<[1], [1], [0], [0], [0, 0, 1, 0], [], []>} : vector<16x32xf32>, vector<16x32xf32>, vector<16x16xf32> -> vector<16x16xf32>
    %cst_43 = arith.constant 0.353553385 : f32
    %126 = vector.broadcast %cst_43 : f32 to vector<16x16xf32>
    %127 = arith.mulf %125, %126 : vector<16x16xf32>
    %128 = arith.addf %127, %42 : vector<16x16xf32>
    %cst_44 = arith.constant dense<0xFF800000> : vector<16xf32>
    %129 = vector.multi_reduction <maximumf>, %128, %cst_44 [1] : vector<16x16xf32> to vector<16xf32>
    %130 = vector.shape_cast %129 : vector<16xf32> to vector<16x1xf32>
    %131 = vector.broadcast %130 : vector<16x1xf32> to vector<16x16xf32>
    %132 = arith.subf %128, %131 : vector<16x16xf32>
    %133 = math.exp %132 : vector<16x16xf32>
    %cst_45 = arith.constant dense<0.000000e+00> : vector<16xf32>
    %134 = vector.multi_reduction <add>, %133, %cst_45 [1] : vector<16x16xf32> to vector<16xf32>
    %135 = vector.shape_cast %134 : vector<16xf32> to vector<16x1xf32>
    %136 = tpu.reciprocal %135 {approx = true} : vector<16x1xf32> -> vector<16x1xf32>
    %137 = vector.broadcast %136 : vector<16x1xf32> to vector<16x16xf32>
    %138 = arith.mulf %133, %137 : vector<16x16xf32>
    %139 = vector.broadcast %64 : vector<1x32xf32> to vector<16x32xf32>
    %140 = arith.mulf %81, %139 : vector<16x32xf32>
    %cst_46 = arith.constant dense<0.000000e+00> : vector<16x32xf32>
    %141 = tpu.matmul %138, %140, %cst_46 {dimension_numbers = #tpu.dot_dimension_numbers<[1], [0], [0], [1], [0, 0, 1, 1], [], []>} : vector<16x16xf32>, vector<16x32xf32>, vector<16x32xf32> -> vector<16x32xf32>
    %142 = arith.addf %122, %141 : vector<16x32xf32>
    %143 = vector.broadcast %71 : vector<1x32xf32> to vector<16x32xf32>
    %144 = arith.mulf %79, %143 : vector<16x32xf32>
    %cst_47 = arith.constant dense<0.000000e+00> : vector<16x16xf32>
    %145 = tpu.matmul %144, %80, %cst_47 {dimension_numbers = #tpu.dot_dimension_numbers<[1], [1], [0], [0], [0, 0, 1, 0], [], []>} : vector<16x32xf32>, vector<16x32xf32>, vector<16x16xf32> -> vector<16x16xf32>
    %cst_48 = arith.constant 0.353553385 : f32
    %146 = vector.broadcast %cst_48 : f32 to vector<16x16xf32>
    %147 = arith.mulf %145, %146 : vector<16x16xf32>
    %148 = arith.addf %147, %42 : vector<16x16xf32>
    %cst_49 = arith.constant dense<0xFF800000> : vector<16xf32>
    %149 = vector.multi_reduction <maximumf>, %148, %cst_49 [1] : vector<16x16xf32> to vector<16xf32>
    %150 = vector.shape_cast %149 : vector<16xf32> to vector<16x1xf32>
    %151 = vector.broadcast %150 : vector<16x1xf32> to vector<16x16xf32>
    %152 = arith.subf %148, %151 : vector<16x16xf32>
    %153 = math.exp %152 : vector<16x16xf32>
    %cst_50 = arith.constant dense<0.000000e+00> : vector<16xf32>
    %154 = vector.multi_reduction <add>, %153, %cst_50 [1] : vector<16x16xf32> to vector<16xf32>
    %155 = vector.shape_cast %154 : vector<16xf32> to vector<16x1xf32>
    %156 = tpu.reciprocal %155 {approx = true} : vector<16x1xf32> -> vector<16x1xf32>
    %157 = vector.broadcast %156 : vector<16x1xf32> to vector<16x16xf32>
    %158 = arith.mulf %153, %157 : vector<16x16xf32>
    %159 = vector.broadcast %71 : vector<1x32xf32> to vector<16x32xf32>
    %160 = arith.mulf %81, %159 : vector<16x32xf32>
    %cst_51 = arith.constant dense<0.000000e+00> : vector<16x32xf32>
    %161 = tpu.matmul %158, %160, %cst_51 {dimension_numbers = #tpu.dot_dimension_numbers<[1], [0], [0], [1], [0, 0, 1, 1], [], []>} : vector<16x16xf32>, vector<16x32xf32>, vector<16x32xf32> -> vector<16x32xf32>
    %162 = arith.addf %142, %161 : vector<16x32xf32>
    %c0_52 = arith.constant 0 : index
    %c0_53 = arith.constant 0 : index
    %c0_54 = arith.constant 0 : index
    %163 = vector.load %arg10[%c0_52, %c0_53, %c0_54] : memref<2x32x32xf32, #tpu.memory_space<vmem>>, vector<1x32x32xf32>
    %164 = vector.shape_cast %163 : vector<1x32x32xf32> to vector<32x32xf32>
    %cst_55 = arith.constant dense<0.000000e+00> : vector<16x32xf32>
    %165 = tpu.matmul %162, %164, %cst_55 {dimension_numbers = #tpu.dot_dimension_numbers<[1], [0], [0], [1], [0, 0, 1, 1], [], []>} : vector<16x32xf32>, vector<32x32xf32>, vector<16x32xf32> -> vector<16x32xf32>
    %c0_56 = arith.constant 0 : index
    %c0_57 = arith.constant 0 : index
    %c0_58 = arith.constant 0 : index
    %166 = vector.load %arg11[%c0_56, %c0_57, %c0_58] : memref<2x1x32xf32, #tpu.memory_space<vmem>>, vector<1x1x32xf32>
    %167 = vector.shape_cast %166 : vector<1x1x32xf32> to vector<1x32xf32>
    %168 = vector.broadcast %167 : vector<1x32xf32> to vector<16x32xf32>
    %169 = arith.addf %165, %168 : vector<16x32xf32>
    %170 = arith.addf %169, %41 : vector<16x32xf32>
    %c0_59 = arith.constant 0 : index
    %c0_60 = arith.constant 0 : index
    %c0_61 = arith.constant 0 : index
    %171 = vector.load %arg12[%c0_59, %c0_60, %c0_61] : memref<2x1x32xf32, #tpu.memory_space<vmem>>, vector<1x1x32xf32>
    %172 = vector.shape_cast %171 : vector<1x1x32xf32> to vector<1x32xf32>
    %c0_62 = arith.constant 0 : index
    %c0_63 = arith.constant 0 : index
    %c0_64 = arith.constant 0 : index
    %173 = vector.load %arg13[%c0_62, %c0_63, %c0_64] : memref<2x1x32xf32, #tpu.memory_space<vmem>>, vector<1x1x32xf32>
    %174 = vector.shape_cast %173 : vector<1x1x32xf32> to vector<1x32xf32>
    %cst_65 = arith.constant dense<0.000000e+00> : vector<16xf32>
    %175 = vector.multi_reduction <add>, %170, %cst_65 [1] : vector<16x32xf32> to vector<16xf32>
    %176 = vector.shape_cast %175 : vector<16xf32> to vector<16x1xf32>
    %cst_66 = arith.constant 3.200000e+01 : f32
    %177 = vector.broadcast %cst_66 : f32 to vector<16x1xf32>
    %178 = arith.divf %176, %177 : vector<16x1xf32>
    %179 = vector.broadcast %178 : vector<16x1xf32> to vector<16x32xf32>
    %180 = arith.subf %170, %179 : vector<16x32xf32>
    %181 = arith.mulf %180, %180 : vector<16x32xf32>
    %cst_67 = arith.constant dense<0.000000e+00> : vector<16xf32>
    %182 = vector.multi_reduction <add>, %181, %cst_67 [1] : vector<16x32xf32> to vector<16xf32>
    %183 = vector.shape_cast %182 : vector<16xf32> to vector<16x1xf32>
    %cst_68 = arith.constant 3.200000e+01 : f32
    %184 = vector.broadcast %cst_68 : f32 to vector<16x1xf32>
    %185 = arith.divf %183, %184 : vector<16x1xf32>
    %cst_69 = arith.constant 9.99999974E-6 : f32
    %186 = vector.broadcast %cst_69 : f32 to vector<16x1xf32>
    %187 = arith.addf %185, %186 : vector<16x1xf32>
    %188 = math.rsqrt %187 : vector<16x1xf32>
    %189 = vector.broadcast %188 : vector<16x1xf32> to vector<16x32xf32>
    %190 = arith.mulf %180, %189 : vector<16x32xf32>
    %191 = vector.broadcast %172 : vector<1x32xf32> to vector<16x32xf32>
    %192 = arith.mulf %190, %191 : vector<16x32xf32>
    %193 = vector.broadcast %174 : vector<1x32xf32> to vector<16x32xf32>
    %194 = arith.addf %192, %193 : vector<16x32xf32>
    %c0_70 = arith.constant 0 : index
    %c0_71 = arith.constant 0 : index
    %c0_72 = arith.constant 0 : index
    %195 = vector.load %arg14[%c0_70, %c0_71, %c0_72] : memref<2x32x64xf32, #tpu.memory_space<vmem>>, vector<1x32x64xf32>
    %196 = vector.shape_cast %195 : vector<1x32x64xf32> to vector<32x64xf32>
    %cst_73 = arith.constant dense<0.000000e+00> : vector<16x64xf32>
    %197 = tpu.matmul %194, %196, %cst_73 {dimension_numbers = #tpu.dot_dimension_numbers<[1], [0], [0], [1], [0, 0, 1, 1], [], []>} : vector<16x32xf32>, vector<32x64xf32>, vector<16x64xf32> -> vector<16x64xf32>
    %c0_74 = arith.constant 0 : index
    %c0_75 = arith.constant 0 : index
    %c0_76 = arith.constant 0 : index
    %198 = vector.load %arg15[%c0_74, %c0_75, %c0_76] : memref<2x1x64xf32, #tpu.memory_space<vmem>>, vector<1x1x64xf32>
    %199 = vector.shape_cast %198 : vector<1x1x64xf32> to vector<1x64xf32>
    %200 = vector.broadcast %199 : vector<1x64xf32> to vector<16x64xf32>
    %201 = arith.addf %197, %200 : vector<16x64xf32>
    %cst_77 = arith.constant 5.000000e-01 : f32
    %202 = vector.broadcast %cst_77 : f32 to vector<16x64xf32>
    %203 = arith.mulf %202, %201 : vector<16x64xf32>
    %cst_78 = arith.constant 4.471500e-02 : f32
    %204 = vector.broadcast %cst_78 : f32 to vector<16x64xf32>
    %205 = arith.mulf %204, %201 : vector<16x64xf32>
    %206 = arith.mulf %205, %201 : vector<16x64xf32>
    %207 = arith.mulf %206, %201 : vector<16x64xf32>
    %208 = arith.addf %201, %207 : vector<16x64xf32>
    %cst_79 = arith.constant 0.797884583 : f32
    %209 = vector.broadcast %cst_79 : f32 to vector<16x64xf32>
    %210 = arith.mulf %209, %208 : vector<16x64xf32>
    %211 = math.tanh %210 : vector<16x64xf32>
    %cst_80 = arith.constant 1.000000e+00 : f32
    %212 = vector.broadcast %cst_80 : f32 to vector<16x64xf32>
    %213 = arith.addf %212, %211 : vector<16x64xf32>
    %214 = arith.mulf %203, %213 : vector<16x64xf32>
    %c0_81 = arith.constant 0 : index
    %c0_82 = arith.constant 0 : index
    %c0_83 = arith.constant 0 : index
    %215 = vector.load %arg16[%c0_81, %c0_82, %c0_83] : memref<2x64x32xf32, #tpu.memory_space<vmem>>, vector<1x64x32xf32>
    %216 = vector.shape_cast %215 : vector<1x64x32xf32> to vector<64x32xf32>
    %cst_84 = arith.constant dense<0.000000e+00> : vector<16x32xf32>
    %217 = tpu.matmul %214, %216, %cst_84 {dimension_numbers = #tpu.dot_dimension_numbers<[1], [0], [0], [1], [0, 0, 1, 1], [], []>} : vector<16x64xf32>, vector<64x32xf32>, vector<16x32xf32> -> vector<16x32xf32>
    %c0_85 = arith.constant 0 : index
    %c0_86 = arith.constant 0 : index
    %c0_87 = arith.constant 0 : index
    %218 = vector.load %arg17[%c0_85, %c0_86, %c0_87] : memref<2x1x32xf32, #tpu.memory_space<vmem>>, vector<1x1x32xf32>
    %219 = vector.shape_cast %218 : vector<1x1x32xf32> to vector<1x32xf32>
    %220 = vector.broadcast %219 : vector<1x32xf32> to vector<16x32xf32>
    %221 = arith.addf %217, %220 : vector<16x32xf32>
    %222 = arith.addf %221, %194 : vector<16x32xf32>
    %c0_88 = arith.constant 0 : index
    %c0_89 = arith.constant 0 : index
    %c0_90 = arith.constant 0 : index
    %223 = vector.load %arg18[%c0_88, %c0_89, %c0_90] : memref<2x1x32xf32, #tpu.memory_space<vmem>>, vector<1x1x32xf32>
    %224 = vector.shape_cast %223 : vector<1x1x32xf32> to vector<1x32xf32>
    %c0_91 = arith.constant 0 : index
    %c0_92 = arith.constant 0 : index
    %c0_93 = arith.constant 0 : index
    %225 = vector.load %arg19[%c0_91, %c0_92, %c0_93] : memref<2x1x32xf32, #tpu.memory_space<vmem>>, vector<1x1x32xf32>
    %226 = vector.shape_cast %225 : vector<1x1x32xf32> to vector<1x32xf32>
    %cst_94 = arith.constant dense<0.000000e+00> : vector<16xf32>
    %227 = vector.multi_reduction <add>, %222, %cst_94 [1] : vector<16x32xf32> to vector<16xf32>
    %228 = vector.shape_cast %227 : vector<16xf32> to vector<16x1xf32>
    %cst_95 = arith.constant 3.200000e+01 : f32
    %229 = vector.broadcast %cst_95 : f32 to vector<16x1xf32>
    %230 = arith.divf %228, %229 : vector<16x1xf32>
    %231 = vector.broadcast %230 : vector<16x1xf32> to vector<16x32xf32>
    %232 = arith.subf %222, %231 : vector<16x32xf32>
    %233 = arith.mulf %232, %232 : vector<16x32xf32>
    %cst_96 = arith.constant dense<0.000000e+00> : vector<16xf32>
    %234 = vector.multi_reduction <add>, %233, %cst_96 [1] : vector<16x32xf32> to vector<16xf32>
    %235 = vector.shape_cast %234 : vector<16xf32> to vector<16x1xf32>
    %cst_97 = arith.constant 3.200000e+01 : f32
    %236 = vector.broadcast %cst_97 : f32 to vector<16x1xf32>
    %237 = arith.divf %235, %236 : vector<16x1xf32>
    %cst_98 = arith.constant 9.99999974E-6 : f32
    %238 = vector.broadcast %cst_98 : f32 to vector<16x1xf32>
    %239 = arith.addf %237, %238 : vector<16x1xf32>
    %240 = math.rsqrt %239 : vector<16x1xf32>
    %241 = vector.broadcast %240 : vector<16x1xf32> to vector<16x32xf32>
    %242 = arith.mulf %232, %241 : vector<16x32xf32>
    %243 = vector.broadcast %224 : vector<1x32xf32> to vector<16x32xf32>
    %244 = arith.mulf %242, %243 : vector<16x32xf32>
    %245 = vector.broadcast %226 : vector<1x32xf32> to vector<16x32xf32>
    %246 = arith.addf %244, %245 : vector<16x32xf32>
    %c1 = arith.constant 1 : index
    %c0_99 = arith.constant 0 : index
    %c0_100 = arith.constant 0 : index
    %247 = vector.load %arg8[%c1, %c0_99, %c0_100] : memref<2x32x96xf32, #tpu.memory_space<vmem>>, vector<1x32x96xf32>
    %248 = vector.shape_cast %247 : vector<1x32x96xf32> to vector<32x96xf32>
    %cst_101 = arith.constant dense<0.000000e+00> : vector<16x96xf32>
    %249 = tpu.matmul %246, %248, %cst_101 {dimension_numbers = #tpu.dot_dimension_numbers<[1], [0], [0], [1], [0, 0, 1, 1], [], []>} : vector<16x32xf32>, vector<32x96xf32>, vector<16x96xf32> -> vector<16x96xf32>
    %c1_102 = arith.constant 1 : index
    %c0_103 = arith.constant 0 : index
    %c0_104 = arith.constant 0 : index
    %250 = vector.load %arg9[%c1_102, %c0_103, %c0_104] : memref<2x1x96xf32, #tpu.memory_space<vmem>>, vector<1x1x96xf32>
    %251 = vector.shape_cast %250 : vector<1x1x96xf32> to vector<1x96xf32>
    %252 = vector.broadcast %251 : vector<1x96xf32> to vector<16x96xf32>
    %253 = arith.addf %249, %252 : vector<16x96xf32>
    %254 = vector.extract_strided_slice %253 {offsets = [0, 0], sizes = [16, 32], strides = [1, 1]} : vector<16x96xf32> to vector<16x32xf32>
    %255 = vector.extract_strided_slice %253 {offsets = [0, 32], sizes = [16, 32], strides = [1, 1]} : vector<16x96xf32> to vector<16x32xf32>
    %256 = vector.extract_strided_slice %253 {offsets = [0, 64], sizes = [16, 32], strides = [1, 1]} : vector<16x96xf32> to vector<16x32xf32>
    %cst_105 = arith.constant 0.000000e+00 : f32
    %257 = vector.broadcast %cst_105 : f32 to vector<16x32xf32>
    %258 = vector.broadcast %50 : vector<1x32xf32> to vector<16x32xf32>
    %259 = arith.mulf %254, %258 : vector<16x32xf32>
    %cst_106 = arith.constant dense<0.000000e+00> : vector<16x16xf32>
    %260 = tpu.matmul %259, %255, %cst_106 {dimension_numbers = #tpu.dot_dimension_numbers<[1], [1], [0], [0], [0, 0, 1, 0], [], []>} : vector<16x32xf32>, vector<16x32xf32>, vector<16x16xf32> -> vector<16x16xf32>
    %cst_107 = arith.constant 0.353553385 : f32
    %261 = vector.broadcast %cst_107 : f32 to vector<16x16xf32>
    %262 = arith.mulf %260, %261 : vector<16x16xf32>
    %263 = arith.addf %262, %42 : vector<16x16xf32>
    %cst_108 = arith.constant dense<0xFF800000> : vector<16xf32>
    %264 = vector.multi_reduction <maximumf>, %263, %cst_108 [1] : vector<16x16xf32> to vector<16xf32>
    %265 = vector.shape_cast %264 : vector<16xf32> to vector<16x1xf32>
    %266 = vector.broadcast %265 : vector<16x1xf32> to vector<16x16xf32>
    %267 = arith.subf %263, %266 : vector<16x16xf32>
    %268 = math.exp %267 : vector<16x16xf32>
    %cst_109 = arith.constant dense<0.000000e+00> : vector<16xf32>
    %269 = vector.multi_reduction <add>, %268, %cst_109 [1] : vector<16x16xf32> to vector<16xf32>
    %270 = vector.shape_cast %269 : vector<16xf32> to vector<16x1xf32>
    %271 = tpu.reciprocal %270 {approx = true} : vector<16x1xf32> -> vector<16x1xf32>
    %272 = vector.broadcast %271 : vector<16x1xf32> to vector<16x16xf32>
    %273 = arith.mulf %268, %272 : vector<16x16xf32>
    %274 = vector.broadcast %50 : vector<1x32xf32> to vector<16x32xf32>
    %275 = arith.mulf %256, %274 : vector<16x32xf32>
    %cst_110 = arith.constant dense<0.000000e+00> : vector<16x32xf32>
    %276 = tpu.matmul %273, %275, %cst_110 {dimension_numbers = #tpu.dot_dimension_numbers<[1], [0], [0], [1], [0, 0, 1, 1], [], []>} : vector<16x16xf32>, vector<16x32xf32>, vector<16x32xf32> -> vector<16x32xf32>
    %277 = arith.addf %257, %276 : vector<16x32xf32>
    %278 = vector.broadcast %57 : vector<1x32xf32> to vector<16x32xf32>
    %279 = arith.mulf %254, %278 : vector<16x32xf32>
    %cst_111 = arith.constant dense<0.000000e+00> : vector<16x16xf32>
    %280 = tpu.matmul %279, %255, %cst_111 {dimension_numbers = #tpu.dot_dimension_numbers<[1], [1], [0], [0], [0, 0, 1, 0], [], []>} : vector<16x32xf32>, vector<16x32xf32>, vector<16x16xf32> -> vector<16x16xf32>
    %cst_112 = arith.constant 0.353553385 : f32
    %281 = vector.broadcast %cst_112 : f32 to vector<16x16xf32>
    %282 = arith.mulf %280, %281 : vector<16x16xf32>
    %283 = arith.addf %282, %42 : vector<16x16xf32>
    %cst_113 = arith.constant dense<0xFF800000> : vector<16xf32>
    %284 = vector.multi_reduction <maximumf>, %283, %cst_113 [1] : vector<16x16xf32> to vector<16xf32>
    %285 = vector.shape_cast %284 : vector<16xf32> to vector<16x1xf32>
    %286 = vector.broadcast %285 : vector<16x1xf32> to vector<16x16xf32>
    %287 = arith.subf %283, %286 : vector<16x16xf32>
    %288 = math.exp %287 : vector<16x16xf32>
    %cst_114 = arith.constant dense<0.000000e+00> : vector<16xf32>
    %289 = vector.multi_reduction <add>, %288, %cst_114 [1] : vector<16x16xf32> to vector<16xf32>
    %290 = vector.shape_cast %289 : vector<16xf32> to vector<16x1xf32>
    %291 = tpu.reciprocal %290 {approx = true} : vector<16x1xf32> -> vector<16x1xf32>
    %292 = vector.broadcast %291 : vector<16x1xf32> to vector<16x16xf32>
    %293 = arith.mulf %288, %292 : vector<16x16xf32>
    %294 = vector.broadcast %57 : vector<1x32xf32> to vector<16x32xf32>
    %295 = arith.mulf %256, %294 : vector<16x32xf32>
    %cst_115 = arith.constant dense<0.000000e+00> : vector<16x32xf32>
    %296 = tpu.matmul %293, %295, %cst_115 {dimension_numbers = #tpu.dot_dimension_numbers<[1], [0], [0], [1], [0, 0, 1, 1], [], []>} : vector<16x16xf32>, vector<16x32xf32>, vector<16x32xf32> -> vector<16x32xf32>
    %297 = arith.addf %277, %296 : vector<16x32xf32>
    %298 = vector.broadcast %64 : vector<1x32xf32> to vector<16x32xf32>
    %299 = arith.mulf %254, %298 : vector<16x32xf32>
    %cst_116 = arith.constant dense<0.000000e+00> : vector<16x16xf32>
    %300 = tpu.matmul %299, %255, %cst_116 {dimension_numbers = #tpu.dot_dimension_numbers<[1], [1], [0], [0], [0, 0, 1, 0], [], []>} : vector<16x32xf32>, vector<16x32xf32>, vector<16x16xf32> -> vector<16x16xf32>
    %cst_117 = arith.constant 0.353553385 : f32
    %301 = vector.broadcast %cst_117 : f32 to vector<16x16xf32>
    %302 = arith.mulf %300, %301 : vector<16x16xf32>
    %303 = arith.addf %302, %42 : vector<16x16xf32>
    %cst_118 = arith.constant dense<0xFF800000> : vector<16xf32>
    %304 = vector.multi_reduction <maximumf>, %303, %cst_118 [1] : vector<16x16xf32> to vector<16xf32>
    %305 = vector.shape_cast %304 : vector<16xf32> to vector<16x1xf32>
    %306 = vector.broadcast %305 : vector<16x1xf32> to vector<16x16xf32>
    %307 = arith.subf %303, %306 : vector<16x16xf32>
    %308 = math.exp %307 : vector<16x16xf32>
    %cst_119 = arith.constant dense<0.000000e+00> : vector<16xf32>
    %309 = vector.multi_reduction <add>, %308, %cst_119 [1] : vector<16x16xf32> to vector<16xf32>
    %310 = vector.shape_cast %309 : vector<16xf32> to vector<16x1xf32>
    %311 = tpu.reciprocal %310 {approx = true} : vector<16x1xf32> -> vector<16x1xf32>
    %312 = vector.broadcast %311 : vector<16x1xf32> to vector<16x16xf32>
    %313 = arith.mulf %308, %312 : vector<16x16xf32>
    %314 = vector.broadcast %64 : vector<1x32xf32> to vector<16x32xf32>
    %315 = arith.mulf %256, %314 : vector<16x32xf32>
    %cst_120 = arith.constant dense<0.000000e+00> : vector<16x32xf32>
    %316 = tpu.matmul %313, %315, %cst_120 {dimension_numbers = #tpu.dot_dimension_numbers<[1], [0], [0], [1], [0, 0, 1, 1], [], []>} : vector<16x16xf32>, vector<16x32xf32>, vector<16x32xf32> -> vector<16x32xf32>
    %317 = arith.addf %297, %316 : vector<16x32xf32>
    %318 = vector.broadcast %71 : vector<1x32xf32> to vector<16x32xf32>
    %319 = arith.mulf %254, %318 : vector<16x32xf32>
    %cst_121 = arith.constant dense<0.000000e+00> : vector<16x16xf32>
    %320 = tpu.matmul %319, %255, %cst_121 {dimension_numbers = #tpu.dot_dimension_numbers<[1], [1], [0], [0], [0, 0, 1, 0], [], []>} : vector<16x32xf32>, vector<16x32xf32>, vector<16x16xf32> -> vector<16x16xf32>
    %cst_122 = arith.constant 0.353553385 : f32
    %321 = vector.broadcast %cst_122 : f32 to vector<16x16xf32>
    %322 = arith.mulf %320, %321 : vector<16x16xf32>
    %323 = arith.addf %322, %42 : vector<16x16xf32>
    %cst_123 = arith.constant dense<0xFF800000> : vector<16xf32>
    %324 = vector.multi_reduction <maximumf>, %323, %cst_123 [1] : vector<16x16xf32> to vector<16xf32>
    %325 = vector.shape_cast %324 : vector<16xf32> to vector<16x1xf32>
    %326 = vector.broadcast %325 : vector<16x1xf32> to vector<16x16xf32>
    %327 = arith.subf %323, %326 : vector<16x16xf32>
    %328 = math.exp %327 : vector<16x16xf32>
    %cst_124 = arith.constant dense<0.000000e+00> : vector<16xf32>
    %329 = vector.multi_reduction <add>, %328, %cst_124 [1] : vector<16x16xf32> to vector<16xf32>
    %330 = vector.shape_cast %329 : vector<16xf32> to vector<16x1xf32>
    %331 = tpu.reciprocal %330 {approx = true} : vector<16x1xf32> -> vector<16x1xf32>
    %332 = vector.broadcast %331 : vector<16x1xf32> to vector<16x16xf32>
    %333 = arith.mulf %328, %332 : vector<16x16xf32>
    %334 = vector.broadcast %71 : vector<1x32xf32> to vector<16x32xf32>
    %335 = arith.mulf %256, %334 : vector<16x32xf32>
    %cst_125 = arith.constant dense<0.000000e+00> : vector<16x32xf32>
    %336 = tpu.matmul %333, %335, %cst_125 {dimension_numbers = #tpu.dot_dimension_numbers<[1], [0], [0], [1], [0, 0, 1, 1], [], []>} : vector<16x16xf32>, vector<16x32xf32>, vector<16x32xf32> -> vector<16x32xf32>
    %337 = arith.addf %317, %336 : vector<16x32xf32>
    %c1_126 = arith.constant 1 : index
    %c0_127 = arith.constant 0 : index
    %c0_128 = arith.constant 0 : index
    %338 = vector.load %arg10[%c1_126, %c0_127, %c0_128] : memref<2x32x32xf32, #tpu.memory_space<vmem>>, vector<1x32x32xf32>
    %339 = vector.shape_cast %338 : vector<1x32x32xf32> to vector<32x32xf32>
    %cst_129 = arith.constant dense<0.000000e+00> : vector<16x32xf32>
    %340 = tpu.matmul %337, %339, %cst_129 {dimension_numbers = #tpu.dot_dimension_numbers<[1], [0], [0], [1], [0, 0, 1, 1], [], []>} : vector<16x32xf32>, vector<32x32xf32>, vector<16x32xf32> -> vector<16x32xf32>
    %c1_130 = arith.constant 1 : index
    %c0_131 = arith.constant 0 : index
    %c0_132 = arith.constant 0 : index
    %341 = vector.load %arg11[%c1_130, %c0_131, %c0_132] : memref<2x1x32xf32, #tpu.memory_space<vmem>>, vector<1x1x32xf32>
    %342 = vector.shape_cast %341 : vector<1x1x32xf32> to vector<1x32xf32>
    %343 = vector.broadcast %342 : vector<1x32xf32> to vector<16x32xf32>
    %344 = arith.addf %340, %343 : vector<16x32xf32>
    %345 = arith.addf %344, %246 : vector<16x32xf32>
    %c1_133 = arith.constant 1 : index
    %c0_134 = arith.constant 0 : index
    %c0_135 = arith.constant 0 : index
    %346 = vector.load %arg12[%c1_133, %c0_134, %c0_135] : memref<2x1x32xf32, #tpu.memory_space<vmem>>, vector<1x1x32xf32>
    %347 = vector.shape_cast %346 : vector<1x1x32xf32> to vector<1x32xf32>
    %c1_136 = arith.constant 1 : index
    %c0_137 = arith.constant 0 : index
    %c0_138 = arith.constant 0 : index
    %348 = vector.load %arg13[%c1_136, %c0_137, %c0_138] : memref<2x1x32xf32, #tpu.memory_space<vmem>>, vector<1x1x32xf32>
    %349 = vector.shape_cast %348 : vector<1x1x32xf32> to vector<1x32xf32>
    %cst_139 = arith.constant dense<0.000000e+00> : vector<16xf32>
    %350 = vector.multi_reduction <add>, %345, %cst_139 [1] : vector<16x32xf32> to vector<16xf32>
    %351 = vector.shape_cast %350 : vector<16xf32> to vector<16x1xf32>
    %cst_140 = arith.constant 3.200000e+01 : f32
    %352 = vector.broadcast %cst_140 : f32 to vector<16x1xf32>
    %353 = arith.divf %351, %352 : vector<16x1xf32>
    %354 = vector.broadcast %353 : vector<16x1xf32> to vector<16x32xf32>
    %355 = arith.subf %345, %354 : vector<16x32xf32>
    %356 = arith.mulf %355, %355 : vector<16x32xf32>
    %cst_141 = arith.constant dense<0.000000e+00> : vector<16xf32>
    %357 = vector.multi_reduction <add>, %356, %cst_141 [1] : vector<16x32xf32> to vector<16xf32>
    %358 = vector.shape_cast %357 : vector<16xf32> to vector<16x1xf32>
    %cst_142 = arith.constant 3.200000e+01 : f32
    %359 = vector.broadcast %cst_142 : f32 to vector<16x1xf32>
    %360 = arith.divf %358, %359 : vector<16x1xf32>
    %cst_143 = arith.constant 9.99999974E-6 : f32
    %361 = vector.broadcast %cst_143 : f32 to vector<16x1xf32>
    %362 = arith.addf %360, %361 : vector<16x1xf32>
    %363 = math.rsqrt %362 : vector<16x1xf32>
    %364 = vector.broadcast %363 : vector<16x1xf32> to vector<16x32xf32>
    %365 = arith.mulf %355, %364 : vector<16x32xf32>
    %366 = vector.broadcast %347 : vector<1x32xf32> to vector<16x32xf32>
    %367 = arith.mulf %365, %366 : vector<16x32xf32>
    %368 = vector.broadcast %349 : vector<1x32xf32> to vector<16x32xf32>
    %369 = arith.addf %367, %368 : vector<16x32xf32>
    %c1_144 = arith.constant 1 : index
    %c0_145 = arith.constant 0 : index
    %c0_146 = arith.constant 0 : index
    %370 = vector.load %arg14[%c1_144, %c0_145, %c0_146] : memref<2x32x64xf32, #tpu.memory_space<vmem>>, vector<1x32x64xf32>
    %371 = vector.shape_cast %370 : vector<1x32x64xf32> to vector<32x64xf32>
    %cst_147 = arith.constant dense<0.000000e+00> : vector<16x64xf32>
    %372 = tpu.matmul %369, %371, %cst_147 {dimension_numbers = #tpu.dot_dimension_numbers<[1], [0], [0], [1], [0, 0, 1, 1], [], []>} : vector<16x32xf32>, vector<32x64xf32>, vector<16x64xf32> -> vector<16x64xf32>
    %c1_148 = arith.constant 1 : index
    %c0_149 = arith.constant 0 : index
    %c0_150 = arith.constant 0 : index
    %373 = vector.load %arg15[%c1_148, %c0_149, %c0_150] : memref<2x1x64xf32, #tpu.memory_space<vmem>>, vector<1x1x64xf32>
    %374 = vector.shape_cast %373 : vector<1x1x64xf32> to vector<1x64xf32>
    %375 = vector.broadcast %374 : vector<1x64xf32> to vector<16x64xf32>
    %376 = arith.addf %372, %375 : vector<16x64xf32>
    %cst_151 = arith.constant 5.000000e-01 : f32
    %377 = vector.broadcast %cst_151 : f32 to vector<16x64xf32>
    %378 = arith.mulf %377, %376 : vector<16x64xf32>
    %cst_152 = arith.constant 4.471500e-02 : f32
    %379 = vector.broadcast %cst_152 : f32 to vector<16x64xf32>
    %380 = arith.mulf %379, %376 : vector<16x64xf32>
    %381 = arith.mulf %380, %376 : vector<16x64xf32>
    %382 = arith.mulf %381, %376 : vector<16x64xf32>
    %383 = arith.addf %376, %382 : vector<16x64xf32>
    %cst_153 = arith.constant 0.797884583 : f32
    %384 = vector.broadcast %cst_153 : f32 to vector<16x64xf32>
    %385 = arith.mulf %384, %383 : vector<16x64xf32>
    %386 = math.tanh %385 : vector<16x64xf32>
    %cst_154 = arith.constant 1.000000e+00 : f32
    %387 = vector.broadcast %cst_154 : f32 to vector<16x64xf32>
    %388 = arith.addf %387, %386 : vector<16x64xf32>
    %389 = arith.mulf %378, %388 : vector<16x64xf32>
    %c1_155 = arith.constant 1 : index
    %c0_156 = arith.constant 0 : index
    %c0_157 = arith.constant 0 : index
    %390 = vector.load %arg16[%c1_155, %c0_156, %c0_157] : memref<2x64x32xf32, #tpu.memory_space<vmem>>, vector<1x64x32xf32>
    %391 = vector.shape_cast %390 : vector<1x64x32xf32> to vector<64x32xf32>
    %cst_158 = arith.constant dense<0.000000e+00> : vector<16x32xf32>
    %392 = tpu.matmul %389, %391, %cst_158 {dimension_numbers = #tpu.dot_dimension_numbers<[1], [0], [0], [1], [0, 0, 1, 1], [], []>} : vector<16x64xf32>, vector<64x32xf32>, vector<16x32xf32> -> vector<16x32xf32>
    %c1_159 = arith.constant 1 : index
    %c0_160 = arith.constant 0 : index
    %c0_161 = arith.constant 0 : index
    %393 = vector.load %arg17[%c1_159, %c0_160, %c0_161] : memref<2x1x32xf32, #tpu.memory_space<vmem>>, vector<1x1x32xf32>
    %394 = vector.shape_cast %393 : vector<1x1x32xf32> to vector<1x32xf32>
    %395 = vector.broadcast %394 : vector<1x32xf32> to vector<16x32xf32>
    %396 = arith.addf %392, %395 : vector<16x32xf32>
    %397 = arith.addf %396, %369 : vector<16x32xf32>
    %c1_162 = arith.constant 1 : index
    %c0_163 = arith.constant 0 : index
    %c0_164 = arith.constant 0 : index
    %398 = vector.load %arg18[%c1_162, %c0_163, %c0_164] : memref<2x1x32xf32, #tpu.memory_space<vmem>>, vector<1x1x32xf32>
    %399 = vector.shape_cast %398 : vector<1x1x32xf32> to vector<1x32xf32>
    %c1_165 = arith.constant 1 : index
    %c0_166 = arith.constant 0 : index
    %c0_167 = arith.constant 0 : index
    %400 = vector.load %arg19[%c1_165, %c0_166, %c0_167] : memref<2x1x32xf32, #tpu.memory_space<vmem>>, vector<1x1x32xf32>
    %401 = vector.shape_cast %400 : vector<1x1x32xf32> to vector<1x32xf32>
    %cst_168 = arith.constant dense<0.000000e+00> : vector<16xf32>
    %402 = vector.multi_reduction <add>, %397, %cst_168 [1] : vector<16x32xf32> to vector<16xf32>
    %403 = vector.shape_cast %402 : vector<16xf32> to vector<16x1xf32>
    %cst_169 = arith.constant 3.200000e+01 : f32
    %404 = vector.broadcast %cst_169 : f32 to vector<16x1xf32>
    %405 = arith.divf %403, %404 : vector<16x1xf32>
    %406 = vector.broadcast %405 : vector<16x1xf32> to vector<16x32xf32>
    %407 = arith.subf %397, %406 : vector<16x32xf32>
    %408 = arith.mulf %407, %407 : vector<16x32xf32>
    %cst_170 = arith.constant dense<0.000000e+00> : vector<16xf32>
    %409 = vector.multi_reduction <add>, %408, %cst_170 [1] : vector<16x32xf32> to vector<16xf32>
    %410 = vector.shape_cast %409 : vector<16xf32> to vector<16x1xf32>
    %cst_171 = arith.constant 3.200000e+01 : f32
    %411 = vector.broadcast %cst_171 : f32 to vector<16x1xf32>
    %412 = arith.divf %410, %411 : vector<16x1xf32>
    %cst_172 = arith.constant 9.99999974E-6 : f32
    %413 = vector.broadcast %cst_172 : f32 to vector<16x1xf32>
    %414 = arith.addf %412, %413 : vector<16x1xf32>
    %415 = math.rsqrt %414 : vector<16x1xf32>
    %416 = vector.broadcast %415 : vector<16x1xf32> to vector<16x32xf32>
    %417 = arith.mulf %407, %416 : vector<16x32xf32>
    %418 = vector.broadcast %399 : vector<1x32xf32> to vector<16x32xf32>
    %419 = arith.mulf %417, %418 : vector<16x32xf32>
    %420 = vector.broadcast %401 : vector<1x32xf32> to vector<16x32xf32>
    %421 = arith.addf %419, %420 : vector<16x32xf32>
    %422 = tpu.iota {dimensions = array<i32: 0>} : vector<8x16xi32>
    %423 = tpu.iota {dimensions = array<i32: 1>} : vector<8x16xi32>
    %c8_i32_173 = arith.constant 8 : i32
    %424 = vector.broadcast %c8_i32_173 : i32 to vector<8x16xi32>
    %425 = arith.muli %422, %424 : vector<8x16xi32>
    %426 = arith.cmpi eq, %423, %425 : vector<8x16xi32>
    %427 = arith.extui %426 : vector<8x16xi1> to vector<8x16xi32>
    %428 = arith.sitofp %427 : vector<8x16xi32> to vector<8x16xf32>
    %cst_174 = arith.constant dense<0.000000e+00> : vector<8x32xf32>
    %429 = tpu.matmul %428, %421, %cst_174 {dimension_numbers = #tpu.dot_dimension_numbers<[1], [0], [0], [1], [0, 0, 1, 1], [], []>} : vector<8x16xf32>, vector<16x32xf32>, vector<8x32xf32> -> vector<8x32xf32>
    %c0_175 = arith.constant 0 : index
    %c0_176 = arith.constant 0 : index
    %430 = vector.load %arg20[%c0_175, %c0_176] : memref<32x64xf32, #tpu.memory_space<vmem>>, vector<32x64xf32>
    %cst_177 = arith.constant dense<0.000000e+00> : vector<8x64xf32>
    %431 = tpu.matmul %429, %430, %cst_177 {dimension_numbers = #tpu.dot_dimension_numbers<[1], [0], [0], [1], [0, 0, 1, 1], [], []>} : vector<8x32xf32>, vector<32x64xf32>, vector<8x64xf32> -> vector<8x64xf32>
    %c0_178 = arith.constant 0 : index
    %c0_179 = arith.constant 0 : index
    %432 = vector.load %arg21[%c0_178, %c0_179] : memref<1x64xf32, #tpu.memory_space<vmem>>, vector<1x64xf32>
    %433 = vector.broadcast %432 : vector<1x64xf32> to vector<8x64xf32>
    %434 = arith.addf %431, %433 : vector<8x64xf32>
    %cst_180 = arith.constant 0.000000e+00 : f32
    %435 = vector.broadcast %cst_180 : f32 to vector<8x64xf32>
    %436 = arith.maximumf %434, %435 : vector<8x64xf32>
    %c0_181 = arith.constant 0 : index
    %c0_182 = arith.constant 0 : index
    %437 = vector.load %arg22[%c0_181, %c0_182] : memref<64x128xf32, #tpu.memory_space<vmem>>, vector<64x128xf32>
    %cst_183 = arith.constant dense<0.000000e+00> : vector<8x128xf32>
    %438 = tpu.matmul %436, %437, %cst_183 {dimension_numbers = #tpu.dot_dimension_numbers<[1], [0], [0], [1], [0, 0, 1, 1], [], []>} : vector<8x64xf32>, vector<64x128xf32>, vector<8x128xf32> -> vector<8x128xf32>
    %c0_184 = arith.constant 0 : index
    %c0_185 = arith.constant 0 : index
    %439 = vector.load %arg23[%c0_184, %c0_185] : memref<1x128xf32, #tpu.memory_space<vmem>>, vector<1x128xf32>
    %440 = vector.broadcast %439 : vector<1x128xf32> to vector<8x128xf32>
    %441 = arith.addf %438, %440 : vector<8x128xf32>
    %c0_186 = arith.constant 0 : index
    %c0_187 = arith.constant 0 : index
    %442 = vector.load %arg24[%c0_186, %c0_187] : memref<8x128xf32, #tpu.memory_space<vmem>>, vector<8x128xf32>
    tpu.vector_store %arg24[%c0_186, %c0_187], %441 {strides = array<i32>} : memref<8x128xf32, #tpu.memory_space<vmem>>, vector<8x128xf32>,
    return
  }
}

</mosaic_0001>

<bundles_post_ra>
// kernel: eq.8
= control target key start
LH: loop header
LB: loop body
LE: loop exit
PB: predicated region body
PF: predicated region fallthrough
CT: control target
= control target key end

     0   :  { %vm7_vm0 = vcmask 64512   ;;  %vm13_vm1 = vcmask 130112   ;;  %s39_s0 = inlined_call_operand.vmem [shape: s32[2,8], index: 0, kind: input, shape index: {}]   ;;  %s40_s1 = inlined_call_operand.vmem [shape: s32[16], index: 1, kind: output, shape index: {}]  }
   0x1   :  { %v4_v0 = vld [vmem:[%s39_s0] sm:$0x3]  ;;  %s22_s0 = smov 8  }
   0x2   :  { %5 = vst [vmem:[#allocation1] sm:$0x3] %v4_v0 }
   0x9   :  { %v10_v1 = vld [vmem:[#allocation1 + $0x1] sm:$0x1]   ;;  %v6_v2 = vld [vmem:[#allocation1] sm:$0x1]  }
   0xa   :  { %11 = vrot.lane.b32.xlu0 %v10_v1, %s22_s0  ;;  %8 = vst.msk [vmem:[#allocation0] sm:$0x1] %vm7_vm0, %v6_v2  }
  0x7c   :  { %v12_v3 = vpop.permute.xlu0 %11  }
  0x7d   :  { %14 = vst.msk [vmem:[#allocation0] sm:$0x1] %vm13_vm1, %v12_v3  }
  0x84   :  { %v18_v4 = vld [vmem:[#allocation0] sm:$0x1] }
  0x85   :  { %20 = vst [vmem:[%s40_s1] sm:$0x1] %v18_v4 }

// kernel: sentiment_forward.1
= control target key start
LH: loop header
LB: loop body
LE: loop exit
PB: predicated region body
PF: predicated region fallthrough
CT: control target
= control target key end

     0   :  { %v4229_v0 = vmov 0   ;;  %v81_v20 = vlaneseq  ;;  %vm128_vm0 = vcmask 523264   ;;  %v4230_v24 = vmov 0.0   ;;  %s5039_s1 = inlined_call_operand.vmem [shape: s32[16,1], index: 1, kind: input, shape index: {}]   ;;  %s5040_s0 = inlined_call_operand.vmem [shape: s32[16,1], index: 0, kind: input, shape index: {}]   ;;  %s5041_s4 = inlined_call_operand.vmem [shape: f32[64,32], index: 4, kind: input, shape index: {}]   ;;  %s5042_s3 = inlined_call_operand.vmem [shape: f32[100,32], index: 3, kind: input, shape index: {}]   ;;  %s5043_s5 = inlined_call_operand.vmem [shape: f32[2,32], index: 5, kind: input, shape index: {}]   ;;  %s5044_s8 = inlined_call_operand.vmem [shape: f32[2,32,96], index: 8, kind: input, shape index: {}]   ;;  %s5045_s6 = inlined_call_operand.vmem [shape: f32[1,32], index: 6, kind: input, shape index: {}]   ;;  %s5046_s7 = inlined_call_operand.vmem [shape: f32[1,32], index: 7, kind: input, shape index: {}]   ;;  %s5047_s9 = inlined_call_operand.vmem [shape: f32[2,1,96], index: 9, kind: input, shape index: {}]   ;;  %s5048_s2 = inlined_call_operand.vmem [shape: f32[16,16], index: 2, kind: input, shape index: {}]   ;;  %s5049_s10 = inlined_call_operand.vmem [shape: f32[2,32,32], index: 10, kind: input, shape index: {}]   ;;  %s5050_s11 = inlined_call_operand.vmem [shape: f32[2,1,32], index: 11, kind: input, shape index: {}]   ;;  %s5051_s14 = inlined_call_operand.vmem [shape: f32[2,32,64], index: 14, kind: input, shape index: {}]   ;;  %s5052_s12 = inlined_call_operand.vmem [shape: f32[2,1,32], index: 12, kind: input, shape index: {}]   ;;  %s5053_s13 = inlined_call_operand.vmem [shape: f32[2,1,32], index: 13, kind: input, shape index: {}]   ;;  %s5054_s16 = inlined_call_operand.vmem [shape: f32[2,64,32], index: 16, kind: input, shape index: {}]   ;;  %s5055_s15 = inlined_call_operand.vmem [shape: f32[2,1,64], index: 15, kind: input, shape index: {}]   ;;  %s5056_s17 = inlined_call_operand.vmem [shape: f32[2,1,32], index: 17, kind: input, shape index: {}]   ;;  %s5057_s18 = inlined_call_operand.vmem [shape: f32[2,1,32], index: 18, kind: input, shape index: {}]   ;;  %s5058_s19 = inlined_call_operand.vmem [shape: f32[2,1,32], index: 19, kind: input, shape index: {}]   ;;  %s5059_s20 = inlined_call_operand.vmem [shape: f32[32,64], index: 20, kind: input, shape index: {}]   ;;  %s5060_s22 = inlined_call_operand.vmem [shape: f32[64,128], index: 22, kind: input, shape index: {}]   ;;  %s5061_s21 = inlined_call_operand.vmem [shape: f32[1,64], index: 21, kind: input, shape index: {}]   ;;  %s5062_s23 = inlined_call_operand.vmem [shape: f32[1,128], index: 23, kind: input, shape index: {}]   ;;  %s5063_s24 = inlined_call_operand.vmem [shape: f32[8,128], index: 24, kind: output, shape index: {}]  }
   0x1   :  { %5070 = sst [smem:[#allocation2_spill]] %s5039_s1  ;;  %4083 = vset.pattern.permute.xlu0 %v4229_v0  ;;  %4084 = vset.pattern.permute.xlu1 %v4229_v0  ;;  %vm210_vm4 = vcmask 818176   ;;  %vm217_vm5 = vcmask 1043456   ;;  %vm305_vm7 = vcmask 261120   ;;  %vm560_vm13 = vcmask 130048  }
   0x2   :  { %5071 = sst [smem:[#allocation3_spill]] %s5040_s0  ;;  %s5079_s27 = sld [smem:[#allocation2_spill]]  ;;  %v4403_v21 = vand.u32 127, %v81_v20  ;;  %vm4509_vm12 = vmpackc.low %vm305_vm7, %vm305_vm7 }
   0x3   :  { %5072 = sst [smem:[#allocation4_spill]] %s5041_s4  ;;  %s5080_s4 = sld [smem:[#allocation3_spill]] }
   0x4   :  { %5073 = sst [smem:[#allocation5_spill]] %s5042_s3  ;;  %s5081_s3 = sld [smem:[#allocation4_spill]]  ;;  %vm352_vm8 = vcmp.lt.s32.totalorder %v4403_v21, 8  ;;  %vm356_vm9 = vcmp.ge.s32.totalorder %v4403_v21, 8  ;;  %vm357_vm10 = vcmp.lt.s32.totalorder %v4403_v21, 16  ;;  %vm361_vm14 = vcmp.ge.s32.totalorder %v4403_v21, 16 }
   0x5   :  { %5074 = sst [smem:[#allocation6_spill]] %s5043_s5  ;;  %vm358_vm11 = vmand %vm356_vm9, %vm357_vm10  ;;  %vm362_vm15 = vcmp.lt.s32.totalorder %v4403_v21, 24 }
   0x6   :  { %5075 = sst [smem:[#allocation7_spill]] %s5044_s8  ;;  %s5082_s8 = sld [smem:[#allocation5_spill]] }
   0x7   :  { %5076 = sst [smem:[#allocation8_spill]] %s5045_s6  ;;  %s5083_s5 = sld [smem:[#allocation6_spill]] }
   0x8   :  { %5077 = sst [smem:[#allocation9_spill]] %s5046_s7  ;;  %v79_v1 = vld [vmem:[%s5079_s27] sm:$0xff]  ;;  %v80_v3 = vld [vmem:[%s5079_s27 + $0x8] sm:$0xff]  ;;  %s5084_s26 = sld [smem:[#allocation7_spill]] }
   0x9   :  { %5078 = sst [smem:[#allocation10_spill]] %s5047_s9  ;;  %v77_v2 = vld [vmem:[%s5080_s4] sm:$0xff]  ;;  %96 = vperm.xlu0 %4083, %v79_v1   ;;  %v78_v6 = vld [vmem:[%s5080_s4 + $0x8] sm:$0xff]  ;;  %s5085_s30 = sld [smem:[#allocation8_spill]] }
   0xa   :  { %84 = vperm.xlu1 %4084, %v77_v2   ;;  %v120_v4 = vld [vmem:[%s5081_s3] sm:$0xff]  ;;  %v121_v5 = vld [vmem:[%s5081_s3 + $0x8] sm:$0xff]  ;;  %v122_v8 = vld [vmem:[%s5081_s3 + $0x10] sm:$0xff]  ;;  %s5087_s28 = sld [smem:[#allocation10_spill]]  ;;  %s4232_s27 = smov 64  }
   0xb   :  { %v3842_v7 = vpack.c.bf16 %v121_v5, %v120_v4  ;;  %v123_v9 = vld [vmem:[%s5081_s3 + $0x18] sm:$0xff]  ;;  %v124_v11 = vld [vmem:[%s5081_s3 + $0x20] sm:$0xff]  ;;  %v125_v12 = vld [vmem:[%s5081_s3 + $0x28] sm:$0xff] }
   0xc   :  { %v3846_v10 = vpack.c.bf16 %v123_v9, %v122_v8  ;;  %v3850_v13 = vpack.c.bf16 %v125_v12, %v124_v11  ;;  %v126_v14 = vld [vmem:[%s5081_s3 + $0x30] sm:$0xff]  ;;  %v127_v15 = vld [vmem:[%s5081_s3 + $0x38] sm:$0xff]  ;;  %v107_v17 = vld [vmem:[%s5082_s8] sm:$0xff]  ;;  %s4231_s3 = smov 96  }
   0xd   :  { %3843 = vmatprep.subr.bf16.mxu0 %v3842_v7  ;;  %99 = vperm.xlu0 %4083, %v80_v3   ;;  %v3854_v16 = vpack.c.bf16 %v127_v15, %v126_v14  ;;  %v108_v18 = vld [vmem:[%s5082_s8 + $0x8] sm:$0xff]  ;;  %v109_v26 = vld [vmem:[%s5082_s8 + $0x10] sm:$0xff]  ;;  %v110_v27 = vld [vmem:[%s5082_s8 + $0x18] sm:$0xff] }
   0xe   :  { %87 = vperm.xlu1 %4084, %v78_v6   ;;  %3845 = vmatpush3.bf16.msra.mxu0 %v3842_v7  ;;  %v3858_v19 = vpack.c.bf16 %v108_v18, %v107_v17  ;;  %v3862_v29 = vpack.c.bf16 %v110_v27, %v109_v26  ;;  %v111_v32 = vld [vmem:[%s5082_s8 + $0x20] sm:$0xff]  ;;  %v112_v33 = vld [vmem:[%s5082_s8 + $0x28] sm:$0xff]  ;;  %v113_v35 = vld [vmem:[%s5082_s8 + $0x30] sm:$0xff] }
   0xf   :  { %3847 = vmatprep.subr.bf16.mxu0 %v3846_v10  ;;  %v3866_v34 = vpack.c.bf16 %v112_v33, %v111_v32  ;;  %v114_v36 = vld [vmem:[%s5082_s8 + $0x38] sm:$0xff]  ;;  %v115_v38 = vld [vmem:[%s5082_s8 + $0x40] sm:$0xff]  ;;  %v116_v39 = vld [vmem:[%s5082_s8 + $0x48] sm:$0xff]  ;;  %v4503_v33 = vsel %vm358_vm11, 1.0, %v4230_v24 }
  0x10   :  { %v3870_v37 = vpack.c.bf16 %v114_v36, %v113_v35  ;;  %v3874_v40 = vpack.c.bf16 %v116_v39, %v115_v38  ;;  %v117_v41 = vld [vmem:[%s5082_s8 + $0x50] sm:$0xff]  ;;  %v118_v42 = vld [vmem:[%s5082_s8 + $0x58] sm:$0xff]  ;;  %v119_v45 = vld [vmem:[%s5082_s8 + $0x60] sm:$0xf] }
  0x11   :  { %v3878_v43 = vpack.c.bf16 %v118_v42, %v117_v41  ;;  %v3258_v47 = vld [vmem:[%s5083_s5] ss:$0 sm:$0xff]  ;;  %v372_v1 = vld [vmem:[%s5084_s26 + $0x8] sm:$0xff]  ;;  %v373_v2 = vld [vmem:[%s5084_s26 + $0x10] sm:$0xff]  ;;  %s5086_s5 = sld [smem:[#allocation9_spill]] }
  0x12   :  { %3849 = vmatpush3.bf16.msra.mxu0 %v3846_v10  ;;  %v371_v0 = vld [vmem:[%s5084_s26] sm:$0xff]  ;;  %v374_v4 = vld [vmem:[%s5084_s26 + $0x18] sm:$0xff] }
  0x13   :  { %3851 = vmatprep.subr.bf16.mxu0 %v3850_v13  ;;  %v3882_v3 = vpack.c.bf16 %v372_v1, %v371_v0  ;;  %v3886_v5 = vpack.c.bf16 %v374_v4, %v373_v2 }
  0x15   :  { %3883 = vmatprep.subr.bf16.mxu1 %v3882_v3 }
  0x16   :  { %3853 = vmatpush3.bf16.msra.mxu0 %v3850_v13  ;;  %3885 = vmatpush3.bf16.msra.mxu1 %v3882_v3  ;;  %v3259_v13 = vld [vmem:[%s5085_s30] ss:$0 sm:$0xff] }
  0x17   :  { %3855 = vmatprep.subr.bf16.mxu0 %v3854_v16  ;;  %3887 = vmatprep.subr.bf16.mxu1 %v3886_v5  ;;  %v3260_v15 = vld [vmem:[%s5086_s5] ss:$0 sm:$0xff] }
  0x1a   :  { %3857 = vmatpush3.bf16.msra.mxu0 %v3854_v16  ;;  %3889 = vmatpush3.bf16.msra.mxu1 %v3886_v5 }
  0x1b   :  { %3859 = vmatprep.subr.bf16.mxu0 %v3858_v19 }
  0x88   :  { %v97_v22 = vpop.permute.xlu0 %96 }
  0x89   :  { %vm101_vm1 = vcmp.eq.s32.totalorder %v97_v22, %v4403_v21  ;;  %v85_v23 = vpop.permute.xlu1 %84 }
  0x8a   :  { %v3251_v25 = vsel %vm101_vm1, 1.0, %v4230_v24  ;;  %vm89_vm2 = vcmp.eq.s32.totalorder %v85_v23, %v4403_v21  ;;  %vm363_vm1 = vmand %vm361_vm14, %vm362_vm15 }
  0x8b   :  { %3557 = vmatprep.mubr.msk.f32.mxu0 %vm128_vm0, %v3251_v25  ;;  %v3249_v30 = vsel %vm89_vm2, 1.0, %v4230_v24  ;;  %v3265_v25 = vld [vmem:[%s5087_s28] ss:$0 sm:$0xff]  ;;  %vm366_vm2 = vcmp.ge.s32.totalorder %v4403_v21, 24 }
  0x8c   :  { %v100_v28 = vpop.permute.xlu0 %99 }
  0x8d   :  { %vm102_vm3 = vcmp.eq.s32.totalorder %v100_v28, %v4403_v21  ;;  %v88_v44 = vpop.permute.xlu1 %87 }
  0x8e   :  { %v3252_v31 = vsel %vm102_vm3, 1.0, %v4230_v24  ;;  %vm90_vm6 = vcmp.eq.s32.totalorder %v88_v44, %v4403_v21  ;;  %vm367_vm3 = vcmp.lt.s32.totalorder %v4403_v21, 32 }
  0x8f   :  { %3558 = vmatmul.mubr.msk.f32.vlgmr.msra.gmra.mrb[0].mxu0 %vm128_vm0, %v3252_v31  ;;  %v3250_v46 = vsel %vm90_vm6, 1.0, %v4230_v24 }
  0x90   :  { %3861 = vmatpush3.bf16.msra.mxu0 %v3858_v19  ;;  %3586 = vmatprep.mubr.msk.f32.mxu0 %vm210_vm4, %v3249_v30 }
  0x91   :  { %3863 = vmatprep.subr.bf16.mxu0 %v3862_v29 }
  0x94   :  { %3865 = vmatpush3.bf16.msra.mxu0 %v3862_v29  ;;  %v4490_v29 = vsel %vm352_vm8, 1.0, %v4230_v24 }
  0x95   :  { %3867 = vmatprep.subr.bf16.mxu0 %v3866_v34 }
  0x98   :  { %3869 = vmatpush3.bf16.msra.mxu0 %v3866_v34 }
  0x99   :  { %3871 = vmatprep.subr.bf16.mxu0 %v3870_v37 }
  0x9c   :  { %3873 = vmatpush3.bf16.msra.mxu0 %v3870_v37 }
  0x9d   :  { %3875 = vmatprep.subr.bf16.mxu0 %v3874_v40 }
  0xa0   :  { %3877 = vmatpush3.bf16.msra.mxu0 %v3874_v40 }
  0xa1   :  { %3879 = vmatprep.subr.bf16.mxu0 %v3878_v43 }
  0xa4   :  { %3881 = vmatpush3.bf16.msra.mxu0 %v3878_v43 }
  0xa5   :  { %3584 = vmatprep.subr.msk.mxu0 %vm217_vm5, %v119_v45 }
  0xa8   :  { %3585 = vmatpush3.msk.msra.mxu0 %vm217_vm5, %v119_v45  ;;  %vm4234_vm5 = vmmov 0  }
  0xa9   :  { %3587 = vmatmul.mubr.msk.f32.vlgmr.msra.gmra.mrb[0].mxu0 %vm210_vm4, %v3250_v46  ;;  %vm368_vm4 = vmand %vm366_vm2, %vm367_vm3 }
 0x17c   :  { %v3588_v48 = vpop.f32.mrb[0].mxu0 }
 0x17d   :  { %v302_v49 = vadd.f32 %v3588_v48, %v3258_v47  ;;  %v287_v50 = vpop.f32.mrb[1].mxu0  ;;  %v4539_v48 = vld [vmem:[%s5048_s2] sm:$0xff] }
 0x17e   :  { %v301_v51 = vadd.f32 %v3258_v47, %v287_v50  ;;  %v4545_v50 = vld [vmem:[%s5048_s2 + $0x8] sm:$0xff] }
 0x17f   :  { %v309_v52 = vsel %vm305_vm7, %v302_v49, 0.0 }
 0x180   :  { %310 = vadd.xlane.f32.xlu1 %v309_v52  ;;  %v306_v53 = vsel %vm305_vm7, %v301_v51, 0.0 }
 0x181   :  { %307 = vadd.xlane.f32.xlu0 %v306_v53 }
 0x20d   :  { %v311_v54 = vpop.xlane.xlu1 %310 }
 0x20e   :  { %v314_v55 = vmul.f32 0.03125, %v311_v54  ;;  %v308_v56 = vpop.xlane.xlu0 %307 }
 0x20f   :  { %v313_v57 = vmul.f32 0.03125, %v308_v56 }
 0x210   :  { %v316_v58 = vsub.f32 %v302_v49, %v314_v55 }
 0x211   :  { %v315_v59 = vsub.f32 %v301_v51, %v313_v57 }
 0x212   :  { %v318_v62 = vmul.f32 %v316_v58, %v316_v58 }
 0x213   :  { %v317_v60 = vmul.f32 %v315_v59, %v315_v59 }
 0x214   :  { %v322_v63 = vsel %vm305_vm7, %v318_v62, 0.0 }
 0x215   :  { %v319_v61 = vsel %vm305_vm7, %v317_v60, 0.0 }
 0x216   :  { %320 = vadd.xlane.f32.xlu0 %v319_v61 }
 0x21a   :  { %323 = vadd.xlane.f32.xlu0 %v322_v63 }
 0x2a3   :  { %v321_v6 = vpop.xlane.xlu0 %320 }
 0x2a4   :  { %v325_v7 = vmul.f32 0.03125, %v321_v6 }
 0x2a6   :  { %v327_v8 = vadd.f32 1e-05, %v325_v7 }
 0x2a7   :  { %v324_v9 = vpop.xlane.xlu0 %323 }
 0x2a8   :  { %4135 = vrsqrt.f32 %v327_v8  ;;  %v326_v10 = vmul.f32 0.03125, %v324_v9 }
 0x2aa   :  { %v328_v11 = vadd.f32 1e-05, %v326_v10 }
 0x2ac   :  { %4137 = vrsqrt.f32 %v328_v11 }
 0x2b2   :  { %v4136_v12 = vpop.eup %4135 }
 0x2b3   :  { %v331_v14 = vmul.f32 %v4136_v12, %v315_v59 }
 0x2b5   :  { %v339_v16 = vmul.f32 %v3259_v13, %v331_v14 }
 0x2b6   :  { %v4138_v17 = vpop.eup %4137 }
 0x2b7   :  { %v332_v18 = vmul.f32 %v4138_v17, %v316_v58  ;;  %v4475_v19 = vadd.f32 %v3260_v15, %v339_v16 }
 0x2b9   :  { %v340_v22 = vmul.f32 %v3259_v13, %v332_v18  ;;  %3597 = vmatprep.mubr.msk.f32.mxu1 %vm305_vm7, %v4475_v19 }
 0x2bb   :  { %v4479_v23 = vadd.f32 %v3260_v15, %v340_v22 }
 0x2bd   :  { %3598 = vmatmul.mubr.msk.f32.vlgmr.msra.gmra.mrb[0].mxu1 %vm305_vm7, %v4479_v23 }
 0x390   :  { %v3599_v26 = vpop.f32.mrb[0].mxu1 }
 0x391   :  { %v4487_v27 = vadd.f32 %v3599_v26, %v3265_v25  ;;  %v454_v28 = vpop.f32.mrb[1].mxu1 }
 0x392   :  { %v4492_v30 = vadd.f32 %v3265_v25, %v454_v28 }
 0x393   :  { %v464_v39 = vmul.f32 %v4490_v29, %v4487_v27  ;;  %v590_v41 = vmul.f32 %v4503_v33, %v4487_v27 }
 0x394   :  { %v4085_v31 = vpack.i.bf16 %v4487_v27, %v4492_v30  ;;  %v463_v32 = vmul.f32 %v4490_v29, %v4492_v30  ;;  %v589_v40 = vmul.f32 %v4503_v33, %v4492_v30 }
 0x396   :  { %4086 = vrot.lane.b32.xlu1 %v4085_v31, %s4231_s3  ;;  %3604 = vmatprep.mubr.msk.f32.mxu1 %vm305_vm7, %v463_v32 }
 0x39a   :  { %699 = vrot.lane.b32.xlu1 %v4503_v33, %s4232_s27 }
 0x408   :  { %v4087_v34 = vpop.permute.xlu1 %4086 }
 0x409   :  { %v4089_v35 = vunpack.i.h.bf16 %v4087_v34  ;;  %v4088_v36 = vunpack.i.l.bf16 %v4087_v34 }
 0x40b   :  { %v4513_v38 = vpack.c.bf16 %v4089_v35, %v4088_v36 }
 0x40c   :  { %v4567_v25 = vpop.permute.xlu1 %699 }
 0x40d   :  { %3892 = vmatprep.subr.msk.bf16.mxu1 %vm4509_vm12, %v4513_v38  ;;  %v702_v26 = vmul.f32 %v4567_v25, %v4492_v30  ;;  %v703_v28 = vmul.f32 %v4567_v25, %v4487_v27 }
 0x40e   :  { %3895 = vmatpush3.bf16.xpose.msk.msra.mxu1 %vm4509_vm12, %v4513_v38 }
 0x40f   :  { %3898 = vmatprep.subr.msk.bf16.mxu1 %vm4509_vm12, %v4513_v38  ;;  %v4090_v31 = vpack.i.bf16 %v703_v28, %v702_v26 }
 0x415   :  { %3605 = vmatmul.mubr.msk.f32.vlgmr.msra.gmra.mrb[2].mxu1 %vm305_vm7, %v464_v39 }
 0x416   :  { %3901 = vmatpush3.bf16.xpose.msk.msra.mxu1 %vm4509_vm12, %v4513_v38  ;;  %3611 = vmatprep.mubr.msk.f32.mxu1 %vm305_vm7, %v589_v40 }
 0x41d   :  { %3612 = vmatmul.mubr.msk.f32.vlgmr.msra.gmra.mrb[4].mxu1 %vm305_vm7, %v590_v41 }
 0x4e8   :  { %v3606_v42 = vpop.f32.mrb[2].mxu1 }
 0x4e9   :  { %v547_v43 = vpop.f32.mrb[3].mxu1  ;;  %v557_v54 = vmul.f32 0.35355338, %v3606_v42 }
 0x4ea   :  { %v556_v51 = vmul.f32 0.35355338, %v547_v43 }
 0x4eb   :  { %v559_v58 = vadd.f32 %v557_v54, %v4545_v50 }
 0x4ec   :  { %v558_v56 = vadd.f32 %v556_v51, %v4539_v48 }
 0x4ed   :  { %v564_v59 = vsel %vm560_vm13, %v559_v58, -inf }
 0x4ee   :  { %v561_v57 = vsel %vm560_vm13, %v558_v56, -inf }
 0x4f0   :  { %v3613_v44 = vpop.f32.mrb[4].mxu1 }
 0x4f1   :  { %v663_v45 = vpop.f32.mrb[5].mxu1  ;;  %v673_v46 = vmul.f32 0.35355338, %v3613_v44 }
 0x4f2   :  { %v672_v47 = vmul.f32 0.35355338, %v663_v45 }
 0x4f3   :  { %v675_v53 = vadd.f32 %v673_v46, %v4545_v50 }
 0x4f4   :  { %v674_v49 = vadd.f32 %v672_v47, %v4539_v48 }
 0x4f5   :  { %v679_v55 = vsel %vm560_vm13, %v675_v53, -inf }
 0x4f6   :  { %v676_v52 = vsel %vm560_vm13, %v674_v49, -inf }
 0x4f7   :  { %677 = vmax.xlane.f32.xlu0 %v676_v52 }
 0x4fb   :  { %680 = vmax.xlane.f32.xlu0 %v679_v55 }
 0x4ff   :  { %562 = vmax.xlane.f32.xlu0 %v561_v57 }
 0x503   :  { %565 = vmax.xlane.f32.xlu0 %v564_v59 }
 0x519   :  { %584 = vrot.lane.b32.xlu0 %v4490_v29, %s4232_s27 }
 0x584   :  { %v678_v60 = vpop.xlane.xlu0 %677 }
 0x585   :  { %v682_v4 = vsub.f32 %v674_v49, %v678_v60 }
 0x587   :  { %v684_v8 = vmul.f32 1.442695, %v682_v4 }
 0x588   :  { %v681_v61 = vpop.xlane.xlu0 %680 }
 0x589   :  { %v683_v62 = vsub.f32 %v675_v53, %v681_v61 }
 0x58b   :  { %v686_v63 = vmul.f32 1.442695, %v683_v62 }
 0x58c   :  { %v563_v0 = vpop.xlane.xlu0 %562 }
 0x58d   :  { %4139 = vpow2.f32 %v686_v63  ;;  %v567_v1 = vsub.f32 %v558_v56, %v563_v0  ;;  %v4583_v56 = vsel %vm363_vm1, 1.0, %v4230_v24 }
 0x58e   :  { %v883_v59 = vmul.f32 %v4583_v56, %v4487_v27 }
 0x58f   :  { %v569_v5 = vmul.f32 1.442695, %v567_v1 }
 0x590   :  { %v566_v2 = vpop.xlane.xlu0 %565 }
 0x591   :  { %v568_v3 = vsub.f32 %v559_v58, %v566_v2  ;;  %v882_v58 = vmul.f32 %v4583_v56, %v4492_v30 }
 0x593   :  { %v571_v6 = vmul.f32 1.442695, %v568_v3 }
 0x594   :  { %v4559_v15 = vpop.permute.xlu0 %584 }
 0x595   :  { %4141 = vpow2.f32 %v571_v6  ;;  %v587_v17 = vmul.f32 %v4559_v15, %v4492_v30  ;;  %v588_v18 = vmul.f32 %v4559_v15, %v4487_v27 }
 0x596   :  { %4143 = vpow2.f32 %v569_v5 }
 0x597   :  { %v4140_v7 = vpop.eup %4139  ;;  %4145 = vpow2.f32 %v684_v8  ;;  %v4095_v22 = vpack.i.bf16 %v588_v18, %v587_v17 }
 0x598   :  { %v691_v9 = vsel %vm560_vm13, %v4140_v7, 0.0 }
 0x599   :  { %692 = vadd.xlane.f32.xlu0 %v691_v9 }
 0x59f   :  { %v4142_v10 = vpop.eup %4141 }
 0x5a0   :  { %v576_v11 = vsel %vm560_vm13, %v4142_v10, 0.0  ;;  %v4144_v12 = vpop.eup %4143 }
 0x5a1   :  { %577 = vadd.xlane.f32.xlu1 %v576_v11  ;;  %v573_v13 = vsel %vm560_vm13, %v4144_v12, 0.0  ;;  %v4146_v14 = vpop.eup %4145 }
 0x5a2   :  { %v688_v16 = vsel %vm560_vm13, %v4146_v14, 0.0 }
 0x5a5   :  { %574 = vadd.xlane.f32.xlu1 %v573_v13 }
 0x5a9   :  { %689 = vadd.xlane.f32.xlu1 %v688_v16 }
 0x5af   :  { %4096 = vrot.lane.b32.xlu0 %v4095_v22, %s4232_s27 }
 0x5ba   :  { %4091 = vrot.lane.b32.xlu1 %v4090_v31, %s4232_s27 }
 0x626   :  { %v693_v34 = vpop.xlane.xlu0 %692 }
 0x627   :  { %4147 = vrcp.f32 %v693_v34 }
 0x62a   :  { %v4097_v39 = vpop.permute.xlu0 %4096 }
 0x62b   :  { %v4099_v41 = vunpack.i.h.bf16 %v4097_v39  ;;  %v4098_v42 = vunpack.i.l.bf16 %v4097_v39  ;;  %v4616_v39 = vsel %vm368_vm4, 1.0, %v4230_v24 }
 0x62d   :  { %v3906_v47 = vpack.c.bf16 %v4099_v41, %v4098_v42  ;;  %v1088_v42 = vmul.f32 %v4616_v39, %v4492_v30 }
 0x62e   :  { %v578_v32 = vpop.xlane.xlu1 %577 }
 0x631   :  { %v4148_v46 = vpop.eup %4147 }
 0x632   :  { %v575_v35 = vpop.xlane.xlu1 %574  ;;  %v697_v53 = vmul.f32 %v4148_v46, %v4140_v7 }
 0x633   :  { %4149 = vrcp.f32 %v575_v35 }
 0x636   :  { %v690_v36 = vpop.xlane.xlu1 %689 }
 0x637   :  { %4151 = vrcp.f32 %v690_v36 }
 0x638   :  { %4153 = vrcp.f32 %v578_v32 }
 0x63a   :  { %v4092_v40 = vpop.permute.xlu1 %4091 }
 0x63b   :  { %v4094_v43 = vunpack.i.h.bf16 %v4092_v40  ;;  %v4093_v44 = vunpack.i.l.bf16 %v4092_v40 }
 0x63d   :  { %v3902_v45 = vpack.c.bf16 %v4094_v43, %v4093_v44  ;;  %v4150_v49 = vpop.eup %4149  ;;  %v1089_v43 = vmul.f32 %v4616_v39, %v4487_v27 }
 0x63e   :  { %v581_v54 = vmul.f32 %v4150_v49, %v4144_v12 }
 0x63f   :  { %3903 = vmatprep.subr.bf16.mxu1 %v3902_v45 }
 0x640   :  { %3905 = vmatpush3.bf16.msra.mxu1 %v3902_v45 }
 0x641   :  { %v4152_v51 = vpop.eup %4151  ;;  %3907 = vmatprep.subr.bf16.mxu1 %v3906_v47 }
 0x642   :  { %v696_v52 = vmul.f32 %v4152_v51, %v4146_v14  ;;  %v4154_v55 = vpop.eup %4153 }
 0x643   :  { %v582_v57 = vmul.f32 %v4154_v55, %v4142_v10 }
 0x644   :  { %3618 = vmatprep.mubr.msk.f32.mxu1 %vm560_vm13, %v696_v52 }
 0x645   :  { %3619 = vmatmul.mubr.msk.f32.vlgmr.msra.gmra.mrb[6].mxu1 %vm560_vm13, %v697_v53 }
 0x646   :  { %3909 = vmatpush3.bf16.msra.mxu1 %v3906_v47  ;;  %3625 = vmatprep.mubr.msk.f32.mxu1 %vm560_vm13, %v581_v54 }
 0x647   :  { %3912 = vmatprep.subr.msk.bf16.mxu1 %vm4509_vm12, %v4513_v38 }
 0x64d   :  { %3626 = vmatmul.mubr.msk.f32.vlgmr.msra.gmra.mrb[6].mxu1 %vm560_vm13, %v582_v57 }
 0x64e   :  { %3632 = vmatprep.mubr.msk.f32.mxu1 %vm305_vm7, %v882_v58 }
 0x64f   :  { %3915 = vmatpush3.bf16.xpose.msk.msra.mxu1 %vm4509_vm12, %v4513_v38 }
 0x656   :  { %3633 = vmatmul.mubr.msk.f32.vlgmr.msra.gmra.mrb[8].mxu1 %vm305_vm7, %v883_v59 }
 0x729   :  { %v3634_v60 = vpop.f32.mrb[8].mxu1 }
 0x72a   :  { %v966_v61 = vmul.f32 0.35355338, %v3634_v60  ;;  %v956_v62 = vpop.f32.mrb[9].mxu1 }
 0x72b   :  { %v965_v63 = vmul.f32 0.35355338, %v956_v62 }
 0x72c   :  { %v968_v0 = vadd.f32 %v966_v61, %v4545_v50 }
 0x72d   :  { %v967_v1 = vadd.f32 %v965_v63, %v4539_v48 }
 0x72e   :  { %v972_v2 = vsel %vm560_vm13, %v968_v0, -inf }
 0x72f   :  { %973 = vmax.xlane.f32.xlu0 %v972_v2  ;;  %v969_v3 = vsel %vm560_vm13, %v967_v1, -inf }
 0x730   :  { %970 = vmax.xlane.f32.xlu1 %v969_v3 }
 0x741   :  { %992 = vrot.lane.b32.xlu1 %v4583_v56, %s4232_s27 }
 0x7bc   :  { %v974_v4 = vpop.xlane.xlu0 %973 }
 0x7bd   :  { %v976_v5 = vsub.f32 %v968_v0, %v974_v4  ;;  %v971_v6 = vpop.xlane.xlu1 %970 }
 0x7be   :  { %v975_v7 = vsub.f32 %v967_v1, %v971_v6 }
 0x7bf   :  { %v979_v8 = vmul.f32 1.442695, %v976_v5 }
 0x7c0   :  { %v977_v9 = vmul.f32 1.442695, %v975_v7  ;;  %v1294_v7 = vld [vmem:[%s5049_s10] sm:$0xff] }
 0x7c1   :  { %4155 = vpow2.f32 %v979_v8  ;;  %v4603_v14 = vpop.permute.xlu1 %992  ;;  %v1295_v8 = vld [vmem:[%s5049_s10 + $0x8] sm:$0xff] }
 0x7c2   :  { %4157 = vpow2.f32 %v977_v9  ;;  %v995_v16 = vmul.f32 %v4603_v14, %v4492_v30  ;;  %v996_v17 = vmul.f32 %v4603_v14, %v4487_v27 }
 0x7c4   :  { %v4100_v18 = vpack.i.bf16 %v996_v17, %v995_v16 }
 0x7cb   :  { %v4156_v10 = vpop.eup %4155 }
 0x7cc   :  { %v984_v11 = vsel %vm560_vm13, %v4156_v10, 0.0  ;;  %v4158_v12 = vpop.eup %4157 }
 0x7cd   :  { %985 = vadd.xlane.f32.xlu0 %v984_v11  ;;  %v981_v13 = vsel %vm560_vm13, %v4158_v12, 0.0 }
 0x7d1   :  { %982 = vadd.xlane.f32.xlu0 %v981_v13  ;;  %v1297_v13 = vld [vmem:[%s5049_s10 + $0x18] sm:$0xff] }
 0x7e7   :  { %4101 = vrot.lane.b32.xlu0 %v4100_v18, %s4232_s27 }
 0x85a   :  { %v986_v22 = vpop.xlane.xlu0 %985 }
 0x85b   :  { %4159 = vrcp.f32 %v986_v22 }
 0x85e   :  { %v983_v26 = vpop.xlane.xlu0 %982 }
 0x85f   :  { %4161 = vrcp.f32 %v983_v26 }
 0x862   :  { %v4102_v28 = vpop.permute.xlu0 %4101 }
 0x863   :  { %v4104_v31 = vunpack.i.h.bf16 %v4102_v28  ;;  %v4103_v32 = vunpack.i.l.bf16 %v4102_v28 }
 0x865   :  { %v3916_v34 = vpack.c.bf16 %v4104_v31, %v4103_v32  ;;  %v4160_v35 = vpop.eup %4159  ;;  %v3292_v31 = vld [vmem:[%s5050_s11] ss:$0 sm:$0xff] }
 0x866   :  { %v990_v41 = vmul.f32 %v4160_v35, %v4156_v10 }
 0x867   :  { %3917 = vmatprep.subr.bf16.mxu1 %v3916_v34 }
 0x868   :  { %3919 = vmatpush3.bf16.msra.mxu1 %v3916_v34 }
 0x869   :  { %v4162_v36 = vpop.eup %4161  ;;  %3922 = vmatprep.subr.msk.bf16.mxu1 %vm4509_vm12, %v4513_v38 }
 0x86a   :  { %v989_v40 = vmul.f32 %v4162_v36, %v4158_v12  ;;  %v1296_v12 = vld [vmem:[%s5049_s10 + $0x10] sm:$0xff] }
 0x86b   :  { %v3934_v22 = vpack.c.bf16 %v1297_v13, %v1296_v12  ;;  %v1543_v12 = vld [vmem:[%s5054_s16 + $0x8] sm:$0xff] }
 0x86c   :  { %3639 = vmatprep.mubr.msk.f32.mxu1 %vm560_vm13, %v989_v40 }
 0x86d   :  { %3640 = vmatmul.mubr.msk.f32.vlgmr.msra.gmra.mrb[6].mxu1 %vm560_vm13, %v990_v41 }
 0x86e   :  { %3646 = vmatprep.mubr.msk.f32.mxu1 %vm305_vm7, %v1088_v42 }
 0x871   :  { %3925 = vmatpush3.bf16.xpose.msk.msra.mxu1 %vm4509_vm12, %v4513_v38 }
 0x878   :  { %3647 = vmatmul.mubr.msk.f32.vlgmr.msra.gmra.mrb[10].mxu1 %vm305_vm7, %v1089_v43 }
 0x94b   :  { %v3648_v44 = vpop.f32.mrb[10].mxu1 }
 0x94c   :  { %v1172_v45 = vmul.f32 0.35355338, %v3648_v44  ;;  %v1162_v46 = vpop.f32.mrb[11].mxu1 }
 0x94d   :  { %v1171_v47 = vmul.f32 0.35355338, %v1162_v46 }
 0x94e   :  { %v1174_v49 = vadd.f32 %v1172_v45, %v4545_v50 }
 0x94f   :  { %v1173_v51 = vadd.f32 %v1171_v47, %v4539_v48 }
 0x950   :  { %v1178_v52 = vsel %vm560_vm13, %v1174_v49, -inf }
 0x951   :  { %1179 = vmax.xlane.f32.xlu0 %v1178_v52  ;;  %v1175_v53 = vsel %vm560_vm13, %v1173_v51, -inf }
 0x952   :  { %1176 = vmax.xlane.f32.xlu1 %v1175_v53 }
 0x963   :  { %1198 = vrot.lane.b32.xlu1 %v4616_v39, %s4232_s27 }
 0x9de   :  { %v1180_v38 = vpop.xlane.xlu0 %1179 }
 0x9df   :  { %v1182_v54 = vsub.f32 %v1174_v49, %v1180_v38  ;;  %v1177_v55 = vpop.xlane.xlu1 %1176 }
 0x9e0   :  { %v1181_v57 = vsub.f32 %v1173_v51, %v1177_v55 }
 0x9e1   :  { %v1185_v58 = vmul.f32 1.442695, %v1182_v54  ;;  %v1433_v54 = vld [vmem:[%s5051_s14 + $0x8] sm:$0xff] }
 0x9e2   :  { %v1183_v59 = vmul.f32 1.442695, %v1181_v57  ;;  %v1434_v57 = vld [vmem:[%s5051_s14 + $0x10] sm:$0xff] }
 0x9e3   :  { %4163 = vpow2.f32 %v1185_v58  ;;  %v4637_v0 = vpop.permute.xlu1 %1198  ;;  %v1435_v58 = vld [vmem:[%s5051_s14 + $0x18] sm:$0xff] }
 0x9e4   :  { %4165 = vpow2.f32 %v1183_v59  ;;  %v1201_v1 = vmul.f32 %v4637_v0, %v4492_v30  ;;  %v1202_v2 = vmul.f32 %v4637_v0, %v4487_v27  ;;  %v3930_v27 = vpack.c.bf16 %v1295_v8, %v1294_v7 }
 0x9e5   :  { %v3942_v59 = vpack.c.bf16 %v1435_v58, %v1434_v57 }
 0x9e6   :  { %v4105_v3 = vpack.i.bf16 %v1202_v2, %v1201_v1 }
 0x9ed   :  { %v4164_v60 = vpop.eup %4163 }
 0x9ee   :  { %v4166_v61 = vpop.eup %4165  ;;  %v1190_v62 = vsel %vm560_vm13, %v4164_v60, 0.0 }
 0x9ef   :  { %1191 = vadd.xlane.f32.xlu1 %v1190_v62  ;;  %v1187_v63 = vsel %vm560_vm13, %v4166_v61, 0.0 }
 0x9f0   :  { %1188 = vadd.xlane.f32.xlu0 %v1187_v63 }
 0xa06   :  { %4106 = vrot.lane.b32.xlu0 %v4105_v3, %s4232_s27 }
 0xa7c   :  { %v1192_v4 = vpop.xlane.xlu1 %1191 }
 0xa7d   :  { %4167 = vrcp.f32 %v1192_v4  ;;  %v1189_v5 = vpop.xlane.xlu0 %1188  ;;  %v3295_v4 = vld [vmem:[%s5052_s12] ss:$0 sm:$0xff] }
 0xa7e   :  { %4169 = vrcp.f32 %v1189_v5 }
 0xa81   :  { %v4107_v6 = vpop.permute.xlu0 %4106 }
 0xa82   :  { %v4109_v30 = vunpack.i.h.bf16 %v4107_v6  ;;  %v4108_v9 = vunpack.i.l.bf16 %v4107_v6  ;;  %v3296_v6 = vld [vmem:[%s5053_s13] ss:$0 sm:$0xff] }
 0xa84   :  { %v3926_v10 = vpack.c.bf16 %v4109_v30, %v4108_v9 }
 0xa86   :  { %3927 = vmatprep.subr.bf16.mxu1 %v3926_v10 }
 0xa87   :  { %v4168_v11 = vpop.eup %4167  ;;  %3929 = vmatpush3.bf16.msra.mxu1 %v3926_v10 }
 0xa88   :  { %v4170_v16 = vpop.eup %4169  ;;  %3931 = vmatprep.subr.bf16.mxu1 %v3930_v27  ;;  %v1196_v18 = vmul.f32 %v4168_v11, %v4164_v60  ;;  %v1542_v11 = vld [vmem:[%s5054_s16] sm:$0xff] }
 0xa89   :  { %v1195_v17 = vmul.f32 %v4170_v16, %v4166_v61  ;;  %v3946_v13 = vpack.c.bf16 %v1543_v12, %v1542_v11  ;;  %v1544_v16 = vld [vmem:[%s5054_s16 + $0x10] sm:$0xff] }
 0xa8b   :  { %3653 = vmatprep.mubr.msk.f32.mxu1 %vm560_vm13, %v1195_v17  ;;  %v1545_v17 = vld [vmem:[%s5054_s16 + $0x18] sm:$0xff] }
 0xa8c   :  { %3654 = vmatmul.mubr.msk.f32.vlgmr.msra.gmra.mrb[6].mxu1 %vm560_vm13, %v1196_v18  ;;  %v1546_v18 = vld [vmem:[%s5054_s16 + $0x20] sm:$0xff] }
 0xa8d   :  { %3933 = vmatpush3.bf16.msra.mxu1 %v3930_v27 }
 0xa8e   :  { %3935 = vmatprep.subr.bf16.mxu1 %v3934_v22 }
 0xa91   :  { %3937 = vmatpush3.bf16.msra.mxu1 %v3934_v22  ;;  %v3950_v22 = vpack.c.bf16 %v1545_v17, %v1544_v16 }
 0xa92   :  { %3947 = vmatprep.subr.bf16.mxu1 %v3946_v13 }
 0xb5f   :  { %v3655_v26 = vpop.f32.mrb[6].mxu1 }
 0xb60   :  { %v1283_v28 = vpop.f32.mrb[7].mxu1 }
 0xb61   :  { %3664 = vmatprep.mubr.msk.f32.mxu1 %vm305_vm7, %v1283_v28 }
 0xb62   :  { %3665 = vmatmul.mubr.msk.f32.vlgmr.msra.gmra.mrb[12].mxu1 %vm305_vm7, %v3655_v26  ;;  %v1547_v26 = vld [vmem:[%s5054_s16 + $0x28] sm:$0xff] }
 0xb63   :  { %3949 = vmatpush3.bf16.msra.mxu1 %v3946_v13  ;;  %v3954_v28 = vpack.c.bf16 %v1547_v26, %v1546_v18  ;;  %v3306_v18 = vld [vmem:[%s5084_s26 + $0x28] sm:$0xff]  ;;  %v3307_v26 = vld [vmem:[%s5084_s26 + $0x30] sm:$0xff] }
 0xb64   :  { %3951 = vmatprep.subr.bf16.mxu1 %v3950_v22 }
 0xb67   :  { %3953 = vmatpush3.bf16.msra.mxu1 %v3950_v22 }
 0xb68   :  { %3955 = vmatprep.subr.bf16.mxu1 %v3954_v28 }
 0xb6b   :  { %3957 = vmatpush3.bf16.msra.mxu1 %v3954_v28  ;;  %v3308_v28 = vld [vmem:[%s5084_s26 + $0x38] sm:$0xff] }
 0xc35   :  { %v3666_v32 = vpop.f32.mrb[12].mxu1 }
 0xc36   :  { %v1383_v34 = vadd.f32 %v3666_v32, %v3292_v31  ;;  %v1377_v35 = vpop.f32.mrb[13].mxu1  ;;  %v1549_v32 = vld [vmem:[%s5054_s16 + $0x38] sm:$0xff] }
 0xc37   :  { %v1378_v36 = vadd.f32 %v3292_v31, %v1377_v35  ;;  %v1548_v31 = vld [vmem:[%s5054_s16 + $0x30] sm:$0xff]  ;;  %v3297_v35 = vld [vmem:[%s5055_s15] ss:$0 sm:$0xff] }
 0xc38   :  { %v1387_v40 = vadd.f32 %v1383_v34, %v4479_v23  ;;  %v3958_v34 = vpack.c.bf16 %v1549_v32, %v1548_v31  ;;  %v3966_v31 = vpack.c.bf16 %v3308_v28, %v3307_v26 }
 0xc39   :  { %v1386_v41 = vadd.f32 %v1378_v36, %v4475_v19  ;;  %v1432_v19 = vld [vmem:[%s5051_s14] sm:$0xff] }
 0xc3a   :  { %v1393_v42 = vsel %vm305_vm7, %v1387_v40, 0.0  ;;  %v3938_v55 = vpack.c.bf16 %v1433_v54, %v1432_v19  ;;  %3959 = vmatprep.subr.bf16.mxu1 %v3958_v34 }
 0xc3b   :  { %1394 = vadd.xlane.f32.xlu1 %v1393_v42  ;;  %v1390_v43 = vsel %vm305_vm7, %v1386_v41, 0.0  ;;  %3961 = vmatpush3.bf16.msra.mxu1 %v3958_v34 }
 0xc3c   :  { %1391 = vadd.xlane.f32.xlu0 %v1390_v43  ;;  %3939 = vmatprep.subr.bf16.mxu0 %v3938_v55 }
 0xc3d   :  { %3941 = vmatpush3.bf16.msra.mxu0 %v3938_v55 }
 0xc3e   :  { %3943 = vmatprep.subr.bf16.mxu0 %v3942_v59 }
 0xc41   :  { %3945 = vmatpush3.bf16.msra.mxu0 %v3942_v59 }
 0xcc8   :  { %v1395_v44 = vpop.xlane.xlu1 %1394 }
 0xcc9   :  { %v1397_v45 = vmul.f32 0.03125, %v1395_v44  ;;  %v1392_v46 = vpop.xlane.xlu0 %1391 }
 0xcca   :  { %v1396_v47 = vmul.f32 0.03125, %v1392_v46 }
 0xccb   :  { %v1399_v49 = vsub.f32 %v1387_v40, %v1397_v45 }
 0xccc   :  { %v1398_v51 = vsub.f32 %v1386_v41, %v1396_v47 }
 0xccd   :  { %v1401_v38 = vmul.f32 %v1399_v49, %v1399_v49 }
 0xcce   :  { %v1400_v52 = vmul.f32 %v1398_v51, %v1398_v51 }
 0xccf   :  { %v1405_v23 = vsel %vm305_vm7, %v1401_v38, 0.0 }
 0xcd0   :  { %v1402_v53 = vsel %vm305_vm7, %v1400_v52, 0.0 }
 0xcd1   :  { %1403 = vadd.xlane.f32.xlu1 %v1402_v53 }
 0xcd5   :  { %1406 = vadd.xlane.f32.xlu1 %v1405_v23 }
 0xd5e   :  { %v1404_v60 = vpop.xlane.xlu1 %1403 }
 0xd5f   :  { %v1408_v61 = vmul.f32 0.03125, %v1404_v60 }
 0xd61   :  { %v1410_v62 = vadd.f32 1e-05, %v1408_v61  ;;  %v3300_v61 = vld [vmem:[%s5056_s17] ss:$0 sm:$0xff] }
 0xd62   :  { %v1407_v63 = vpop.xlane.xlu1 %1406 }
 0xd63   :  { %4171 = vrsqrt.f32 %v1410_v62  ;;  %v1409_v1 = vmul.f32 0.03125, %v1407_v63 }
 0xd65   :  { %v1411_v2 = vadd.f32 1e-05, %v1409_v1 }
 0xd67   :  { %4173 = vrsqrt.f32 %v1411_v2 }
 0xd6d   :  { %v4172_v3 = vpop.eup %4171 }
 0xd6e   :  { %v1414_v5 = vmul.f32 %v4172_v3, %v1398_v51 }
 0xd70   :  { %v1422_v7 = vmul.f32 %v3295_v4, %v1414_v5 }
 0xd71   :  { %v4174_v8 = vpop.eup %4173 }
 0xd72   :  { %v1415_v30 = vmul.f32 %v4174_v8, %v1399_v49  ;;  %v1430_v9 = vadd.f32 %v3296_v6, %v1422_v7 }
 0xd74   :  { %v1423_v10 = vmul.f32 %v3295_v4, %v1415_v30  ;;  %3675 = vmatprep.mubr.msk.f32.mxu0 %vm305_vm7, %v1430_v9 }
 0xd76   :  { %v1431_v27 = vadd.f32 %v3296_v6, %v1423_v10 }
 0xd78   :  { %3676 = vmatmul.mubr.msk.f32.vlgmr.msra.gmra.mrb[2].mxu0 %vm305_vm7, %v1431_v27 }
 0xe4b   :  { %v3677_v36 = vpop.f32.mrb[2].mxu0 }
 0xe4c   :  { %v1521_v40 = vadd.f32 %v3677_v36, %v3297_v35  ;;  %v1515_v41 = vpop.f32.mrb[3].mxu0 }
 0xe4d   :  { %v1516_v42 = vadd.f32 %v3297_v35, %v1515_v41 }
 0xe4e   :  { %v1527_v43 = vmul.f32 0.044715, %v1521_v40  ;;  %v1525_v58 = vmul.f32 0.5, %v1521_v40 }
 0xe4f   :  { %v1526_v44 = vmul.f32 0.044715, %v1516_v42  ;;  %v1524_v55 = vmul.f32 0.5, %v1516_v42 }
 0xe50   :  { %v1529_v45 = vmul.f32 %v1527_v43, %v1521_v40  ;;  %v3303_v43 = vld [vmem:[%s5057_s18] ss:$0 sm:$0xff] }
 0xe51   :  { %v1528_v46 = vmul.f32 %v1526_v44, %v1516_v42 }
 0xe52   :  { %v1531_v47 = vmul.f32 %v1529_v45, %v1521_v40  ;;  %v3304_v45 = vld [vmem:[%s5058_s19] ss:$0 sm:$0xff] }
 0xe53   :  { %v1530_v49 = vmul.f32 %v1528_v46, %v1516_v42 }
 0xe54   :  { %v1533_v51 = vadd.f32 %v1531_v47, %v1521_v40 }
 0xe55   :  { %v1532_v52 = vadd.f32 %v1530_v49, %v1516_v42 }
 0xe56   :  { %v1535_v53 = vmul.f32 0.7978846, %v1533_v51 }
 0xe57   :  { %v1534_v38 = vmul.f32 0.7978846, %v1532_v52 }
 0xe58   :  { %4175 = vtanh.f32 %v1535_v53 }
 0xe59   :  { %4177 = vtanh.f32 %v1534_v38  ;;  %v3310_v38 = vld [vmem:[%s5087_s28 + $0x1] ss:$0 sm:$0xff] }
 0xe62   :  { %v4176_v23 = vpop.eup %4175 }
 0xe63   :  { %v4178_v19 = vpop.eup %4177  ;;  %v1539_v54 = vadd.f32 1.0, %v4176_v23 }
 0xe64   :  { %v1538_v57 = vadd.f32 1.0, %v4178_v19 }
 0xe65   :  { %v1541_v60 = vmul.f32 %v1539_v54, %v1525_v58 }
 0xe66   :  { %v1540_v59 = vmul.f32 %v1538_v57, %v1524_v55 }
 0xe68   :  { %3694 = vmatprep.mubr.msk.f32.mxu1 %vm128_vm0, %v1540_v59 }
 0xe69   :  { %3695 = vmatmul.mubr.msk.f32.vlgmr.msra.gmra.mrb[14].mxu1 %vm128_vm0, %v1541_v60 }
 0xf3c   :  { %v3696_v62 = vpop.f32.mrb[14].mxu1 }
 0xf3d   :  { %v1629_v63 = vpop.f32.mrb[15].mxu1  ;;  %v1635_v1 = vadd.f32 %v3696_v62, %v3300_v61 }
 0xf3e   :  { %v1630_v2 = vadd.f32 %v3300_v61, %v1629_v63 }
 0xf3f   :  { %v1639_v5 = vadd.f32 %v1635_v1, %v1431_v27  ;;  %v3305_v27 = vld [vmem:[%s5084_s26 + $0x20] sm:$0xff] }
 0xf40   :  { %v1638_v3 = vadd.f32 %v1630_v2, %v1430_v9  ;;  %v3962_v22 = vpack.c.bf16 %v3306_v18, %v3305_v27 }
 0xf41   :  { %v1645_v6 = vsel %vm305_vm7, %v1639_v5, 0.0 }
 0xf42   :  { %v1642_v4 = vsel %vm305_vm7, %v1638_v3, 0.0  ;;  %3963 = vmatprep.subr.bf16.mxu0 %v3962_v22 }
 0xf43   :  { %1643 = vadd.xlane.f32.xlu1 %v1642_v4  ;;  %3965 = vmatpush3.bf16.msra.mxu0 %v3962_v22 }
 0xf44   :  { %3967 = vmatprep.subr.bf16.mxu0 %v3966_v31 }
 0xf47   :  { %1646 = vadd.xlane.f32.xlu1 %v1645_v6  ;;  %3969 = vmatpush3.bf16.msra.mxu0 %v3966_v31 }
 0xfd0   :  { %v1644_v7 = vpop.xlane.xlu1 %1643 }
 0xfd1   :  { %v1648_v8 = vmul.f32 0.03125, %v1644_v7 }
 0xfd3   :  { %v1650_v30 = vsub.f32 %v1638_v3, %v1648_v8 }
 0xfd4   :  { %v1647_v10 = vpop.xlane.xlu1 %1646 }
 0xfd5   :  { %v1649_v11 = vmul.f32 0.03125, %v1647_v10  ;;  %v1652_v12 = vmul.f32 %v1650_v30, %v1650_v30 }
 0xfd7   :  { %v1651_v13 = vsub.f32 %v1639_v5, %v1649_v11  ;;  %v1654_v16 = vsel %vm305_vm7, %v1652_v12, 0.0 }
 0xfd8   :  { %1655 = vadd.xlane.f32.xlu0 %v1654_v16 }
 0xfd9   :  { %v1653_v17 = vmul.f32 %v1651_v13, %v1651_v13 }
 0xfdb   :  { %v1657_v9 = vsel %vm305_vm7, %v1653_v17, 0.0 }
 0xfdc   :  { %1658 = vadd.xlane.f32.xlu1 %v1657_v9 }
0x1065   :  { %v1656_v32 = vpop.xlane.xlu0 %1655 }
0x1066   :  { %v1660_v34 = vmul.f32 0.03125, %v1656_v32 }
0x1068   :  { %v1662_v35 = vadd.f32 1e-05, %v1660_v34 }
0x1069   :  { %v1659_v36 = vpop.xlane.xlu1 %1658 }
0x106a   :  { %4179 = vrsqrt.f32 %v1662_v35  ;;  %v1661_v40 = vmul.f32 0.03125, %v1659_v36 }
0x106c   :  { %v1663_v41 = vadd.f32 1e-05, %v1661_v40 }
0x106e   :  { %4181 = vrsqrt.f32 %v1663_v41 }
0x1074   :  { %v4180_v42 = vpop.eup %4179 }
0x1075   :  { %v1666_v44 = vmul.f32 %v4180_v42, %v1650_v30 }
0x1077   :  { %v1674_v46 = vmul.f32 %v3303_v43, %v1666_v44 }
0x1078   :  { %v4182_v47 = vpop.eup %4181 }
0x1079   :  { %v1667_v49 = vmul.f32 %v4182_v47, %v1651_v13  ;;  %v4743_v51 = vadd.f32 %v3304_v45, %v1674_v46 }
0x107b   :  { %v1675_v52 = vmul.f32 %v3303_v43, %v1667_v49  ;;  %3705 = vmatprep.mubr.msk.f32.mxu0 %vm305_vm7, %v4743_v51 }
0x107d   :  { %v4747_v53 = vadd.f32 %v3304_v45, %v1675_v52 }
0x107f   :  { %3706 = vmatmul.mubr.msk.f32.vlgmr.msra.gmra.mrb[4].mxu0 %vm305_vm7, %v4747_v53 }
0x1152   :  { %v3707_v23 = vpop.f32.mrb[4].mxu0 }
0x1153   :  { %v4754_v19 = vadd.f32 %v3707_v23, %v3310_v38  ;;  %v1769_v54 = vpop.f32.mrb[5].mxu0 }
0x1154   :  { %v4756_v55 = vadd.f32 %v3310_v38, %v1769_v54 }
0x1155   :  { %v4760_v57 = vmul.f32 %v4754_v19, %v4567_v25  ;;  %v4776_v63 = vmul.f32 %v4754_v19, %v4559_v15  ;;  %v4786_v2 = vmul.f32 %v4754_v19, %v4603_v14  ;;  %v4798_v4 = vmul.f32 %v4754_v19, %v4637_v0 }
0x1156   :  { %v4110_v58 = vpack.i.bf16 %v4754_v19, %v4756_v55  ;;  %v1778_v59 = vmul.f32 %v4490_v29, %v4756_v55  ;;  %v1899_v60 = vmul.f32 %v4503_v33, %v4756_v55  ;;  %v2008_v61 = vmul.f32 %v4756_v55, %v4567_v25 }
0x1157   :  { %v4772_v62 = vmul.f32 %v4756_v55, %v4559_v15  ;;  %v4780_v1 = vmul.f32 %v4756_v55, %v4603_v14  ;;  %v4794_v3 = vmul.f32 %v4756_v55, %v4637_v0  ;;  %v1779_v0 = vmul.f32 %v4490_v29, %v4754_v19 }
0x1158   :  { %4111 = vrot.lane.b32.xlu0 %v4110_v58, %s4231_s3  ;;  %3712 = vmatprep.mubr.msk.f32.mxu0 %vm305_vm7, %v1778_v59  ;;  %v4115_v25 = vpack.i.bf16 %v4760_v57, %v2008_v61  ;;  %v1900_v10 = vmul.f32 %v4503_v33, %v4754_v19  ;;  %v2188_v11 = vmul.f32 %v4583_v56, %v4756_v55 }
0x1159   :  { %3719 = vmatprep.mubr.msk.f32.mxu1 %vm305_vm7, %v1899_v60  ;;  %v4120_v15 = vpack.i.bf16 %v4776_v63, %v4772_v62  ;;  %v4125_v5 = vpack.i.bf16 %v4786_v2, %v4780_v1  ;;  %v4130_v14 = vpack.i.bf16 %v4798_v4, %v4794_v3  ;;  %v2189_v12 = vmul.f32 %v4583_v56, %v4754_v19 }
0x11ca   :  { %v4112_v6 = vpop.permute.xlu0 %4111 }
0x11cb   :  { %v4114_v7 = vunpack.i.h.bf16 %v4112_v6  ;;  %v4113_v8 = vunpack.i.l.bf16 %v4112_v6 }
0x11cd   :  { %v4804_v30 = vpack.c.bf16 %v4114_v7, %v4113_v8 }
0x11cf   :  { %3972 = vmatprep.subr.msk.bf16.mxu0 %vm4509_vm12, %v4804_v30  ;;  %3978 = vmatprep.subr.msk.bf16.mxu1 %vm4509_vm12, %v4804_v30 }
0x11d0   :  { %3975 = vmatpush3.bf16.xpose.msk.msra.mxu0 %vm4509_vm12, %v4804_v30  ;;  %3981 = vmatpush3.bf16.xpose.msk.msra.mxu1 %vm4509_vm12, %v4804_v30 }
0x11d1   :  { %3992 = vmatprep.subr.msk.bf16.mxu1 %vm4509_vm12, %v4804_v30 }
0x11d7   :  { %3713 = vmatmul.mubr.msk.f32.vlgmr.msra.gmra.mrb[6].mxu0 %vm305_vm7, %v1779_v0  ;;  %3720 = vmatmul.mubr.msk.f32.vlgmr.msra.gmra.mrb[16].mxu1 %vm305_vm7, %v1900_v10 }
0x11d8   :  { %3995 = vmatpush3.bf16.xpose.msk.msra.mxu1 %vm4509_vm12, %v4804_v30  ;;  %3740 = vmatprep.mubr.msk.f32.mxu1 %vm305_vm7, %v2188_v11 }
0x11df   :  { %3741 = vmatmul.mubr.msk.f32.vlgmr.msra.gmra.mrb[18].mxu1 %vm305_vm7, %v2189_v12 }
0x12aa   :  { %v3714_v29 = vpop.f32.mrb[6].mxu0  ;;  %v3721_v33 = vpop.f32.mrb[16].mxu1 }
0x12ab   :  { %v1983_v13 = vmul.f32 0.35355338, %v3721_v33  ;;  %v1862_v16 = vpop.f32.mrb[7].mxu0  ;;  %v1973_v17 = vpop.f32.mrb[17].mxu1  ;;  %v1872_v18 = vmul.f32 0.35355338, %v3714_v29 }
0x12ac   :  { %v1982_v9 = vmul.f32 0.35355338, %v1973_v17  ;;  %v1871_v31 = vmul.f32 0.35355338, %v1862_v16 }
0x12ad   :  { %v1985_v27 = vadd.f32 %v1983_v13, %v4545_v50  ;;  %v1874_v34 = vadd.f32 %v1872_v18, %v4545_v50 }
0x12ae   :  { %v1984_v26 = vadd.f32 %v1982_v9, %v4539_v48  ;;  %v1873_v40 = vadd.f32 %v1871_v31, %v4539_v48 }
0x12af   :  { %v1989_v22 = vsel %vm560_vm13, %v1985_v27, -inf  ;;  %v1878_v36 = vsel %vm560_vm13, %v1874_v34, -inf }
0x12b0   :  { %1990 = vmax.xlane.f32.xlu1 %v1989_v22  ;;  %v1986_v56 = vsel %vm560_vm13, %v1984_v26, -inf  ;;  %v1875_v42 = vsel %vm560_vm13, %v1873_v40, -inf }
0x12b2   :  { %v3742_v28 = vpop.f32.mrb[18].mxu1 }
0x12b3   :  { %v2262_v32 = vpop.f32.mrb[19].mxu1  ;;  %v2272_v35 = vmul.f32 0.35355338, %v3742_v28 }
0x12b4   :  { %1987 = vmax.xlane.f32.xlu1 %v1986_v56  ;;  %v2271_v41 = vmul.f32 0.35355338, %v2262_v32 }
0x12b5   :  { %v2274_v43 = vadd.f32 %v2272_v35, %v4545_v50 }
0x12b6   :  { %v2273_v45 = vadd.f32 %v2271_v41, %v4539_v48 }
0x12b7   :  { %v2278_v44 = vsel %vm560_vm13, %v2274_v43, -inf }
0x12b8   :  { %1879 = vmax.xlane.f32.xlu1 %v1878_v36  ;;  %v2275_v46 = vsel %vm560_vm13, %v2273_v45, -inf }
0x12bc   :  { %1876 = vmax.xlane.f32.xlu1 %v1875_v42 }
0x12c0   :  { %2279 = vmax.xlane.f32.xlu1 %v2278_v44 }
0x12c4   :  { %2276 = vmax.xlane.f32.xlu1 %v2275_v46 }
0x12d5   :  { %4116 = vrot.lane.b32.xlu1 %v4115_v25, %s4232_s27 }
0x133d   :  { %v1991_v47 = vpop.xlane.xlu1 %1990 }
0x133e   :  { %v1993_v49 = vsub.f32 %v1985_v27, %v1991_v47 }
0x1340   :  { %v1996_v52 = vmul.f32 1.442695, %v1993_v49 }
0x1341   :  { %v1988_v38 = vpop.xlane.xlu1 %1987 }
0x1342   :  { %4183 = vpow2.f32 %v1996_v52  ;;  %v1992_v23 = vsub.f32 %v1984_v26, %v1988_v38 }
0x1344   :  { %v1994_v54 = vmul.f32 1.442695, %v1992_v23 }
0x1345   :  { %v1880_v57 = vpop.xlane.xlu1 %1879 }
0x1346   :  { %4185 = vpow2.f32 %v1994_v54  ;;  %v1882_v50 = vsub.f32 %v1874_v34, %v1880_v57 }
0x1348   :  { %v1885_v58 = vmul.f32 1.442695, %v1882_v50 }
0x1349   :  { %v1877_v59 = vpop.xlane.xlu1 %1876 }
0x134a   :  { %4187 = vpow2.f32 %v1885_v58  ;;  %v1881_v48 = vsub.f32 %v1873_v40, %v1877_v59  ;;  %v2390_v59 = vmul.f32 %v4616_v39, %v4756_v55  ;;  %v4227_v55 = vld [vmem:[%s5048_s2 + $0x8] sm:$0xff] }
0x134c   :  { %v4184_v60 = vpop.eup %4183  ;;  %v1883_v61 = vmul.f32 1.442695, %v1881_v48  ;;  %v2391_v48 = vmul.f32 %v4616_v39, %v4754_v19 }
0x134d   :  { %v2280_v6 = vpop.xlane.xlu1 %2279  ;;  %v2001_v7 = vsel %vm560_vm13, %v4184_v60, 0.0 }
0x134e   :  { %4189 = vpow2.f32 %v1883_v61  ;;  %v2282_v25 = vsub.f32 %v2274_v43, %v2280_v6  ;;  %2002 = vadd.xlane.f32.xlu1 %v2001_v7 }
0x1350   :  { %v4186_v8 = vpop.eup %4185  ;;  %v2285_v0 = vmul.f32 1.442695, %v2282_v25 }
0x1351   :  { %v2277_v10 = vpop.xlane.xlu1 %2276  ;;  %v1998_v11 = vsel %vm560_vm13, %v4186_v8, 0.0 }
0x1352   :  { %4191 = vpow2.f32 %v2285_v0  ;;  %v2281_v12 = vsub.f32 %v2273_v45, %v2277_v10  ;;  %1999 = vadd.xlane.f32.xlu0 %v1998_v11 }
0x1354   :  { %v4188_v29 = vpop.eup %4187  ;;  %v2283_v33 = vmul.f32 1.442695, %v2281_v12 }
0x1355   :  { %v4117_v13 = vpop.permute.xlu1 %4116  ;;  %v1890_v16 = vsel %vm560_vm13, %v4188_v29, 0.0 }
0x1356   :  { %4193 = vpow2.f32 %v2283_v33  ;;  %v4119_v17 = vunpack.i.h.bf16 %v4117_v13  ;;  %v4118_v9 = vunpack.i.l.bf16 %v4117_v13  ;;  %1891 = vadd.xlane.f32.xlu1 %v1890_v16 }
0x1358   :  { %v4190_v27 = vpop.eup %4189  ;;  %v3982_v18 = vpack.c.bf16 %v4119_v17, %v4118_v9  ;;  %v3337_v9 = vld [vmem:[%s5049_s10 + $0x20] sm:$0xff] }
0x1359   :  { %v1887_v22 = vsel %vm560_vm13, %v4190_v27, 0.0 }
0x135a   :  { %1888 = vadd.xlane.f32.xlu1 %v1887_v22  ;;  %3983 = vmatprep.subr.bf16.mxu0 %v3982_v18 }
0x135b   :  { %3985 = vmatpush3.bf16.msra.mxu0 %v3982_v18  ;;  %v3339_v18 = vld [vmem:[%s5049_s10 + $0x30] sm:$0xff] }
0x135c   :  { %v4192_v26 = vpop.eup %4191 }
0x135d   :  { %v2290_v28 = vsel %vm560_vm13, %v4192_v26, 0.0 }
0x135e   :  { %2291 = vadd.xlane.f32.xlu1 %v2290_v28 }
0x1360   :  { %v4194_v31 = vpop.eup %4193 }
0x1361   :  { %v2287_v32 = vsel %vm560_vm13, %v4194_v31, 0.0 }
0x1362   :  { %2288 = vadd.xlane.f32.xlu1 %v2287_v32 }
0x1368   :  { %4121 = vrot.lane.b32.xlu0 %v4120_v15, %s4232_s27 }
0x1373   :  { %4126 = vrot.lane.b32.xlu1 %v4125_v5, %s4232_s27 }
0x13db   :  { %v2003_v56 = vpop.xlane.xlu1 %2002 }
0x13dc   :  { %4195 = vrcp.f32 %v2003_v56 }
0x13df   :  { %v2000_v34 = vpop.xlane.xlu0 %1999 }
0x13e0   :  { %4197 = vrcp.f32 %v2000_v34 }
0x13e3   :  { %v4122_v35 = vpop.permute.xlu0 %4121  ;;  %v1892_v36 = vpop.xlane.xlu1 %1891 }
0x13e4   :  { %v4124_v40 = vunpack.i.h.bf16 %v4122_v35  ;;  %v4123_v41 = vunpack.i.l.bf16 %v4122_v35  ;;  %4199 = vrcp.f32 %v1892_v36 }
0x13e6   :  { %v3986_v42 = vpack.c.bf16 %v4124_v40, %v4123_v41  ;;  %v4196_v62 = vpop.eup %4195 }
0x13e7   :  { %v1889_v43 = vpop.xlane.xlu1 %1888  ;;  %v2007_v45 = vmul.f32 %v4196_v62, %v4184_v60 }
0x13e8   :  { %4201 = vrcp.f32 %v1889_v43  ;;  %3987 = vmatprep.subr.bf16.mxu0 %v3986_v42  ;;  %v3342_v43 = vld [vmem:[%s5050_s11 + $0x1] ss:$0 sm:$0xff] }
0x13ea   :  { %v4198_v63 = vpop.eup %4197 }
0x13eb   :  { %v2292_v15 = vpop.xlane.xlu1 %2291  ;;  %v2006_v44 = vmul.f32 %v4198_v63, %v4186_v8  ;;  %v4228_v8 = vld [vmem:[%s5048_s2] sm:$0xff] }
0x13ec   :  { %4203 = vrcp.f32 %v2292_v15 }
0x13ed   :  { %3726 = vmatprep.mubr.msk.f32.mxu0 %vm560_vm13, %v2006_v44 }
0x13ee   :  { %3727 = vmatmul.mubr.msk.f32.vlgmr.msra.gmra.mrb[8].mxu0 %vm560_vm13, %v2007_v45  ;;  %v4200_v2 = vpop.eup %4199 }
0x13ef   :  { %3989 = vmatpush3.bf16.msra.mxu0 %v3986_v42  ;;  %v2289_v1 = vpop.xlane.xlu1 %2288  ;;  %v1896_v49 = vmul.f32 %v4200_v2, %v4188_v29 }
0x13f0   :  { %4205 = vrcp.f32 %v2289_v1 }
0x13f2   :  { %v4202_v5 = vpop.eup %4201 }
0x13f3   :  { %v4127_v46 = vpop.permute.xlu1 %4126  ;;  %v1895_v47 = vmul.f32 %v4202_v5, %v4190_v27  ;;  %v3338_v27 = vld [vmem:[%s5049_s10 + $0x28] sm:$0xff] }
0x13f4   :  { %v4129_v52 = vunpack.i.h.bf16 %v4127_v46  ;;  %v4128_v38 = vunpack.i.l.bf16 %v4127_v46  ;;  %v4010_v22 = vpack.c.bf16 %v3338_v27, %v3337_v9  ;;  %v3359_v9 = vld [vmem:[%s5054_s16 + $0x50] sm:$0xff] }
0x13f5   :  { %3733 = vmatprep.mubr.msk.f32.mxu0 %vm560_vm13, %v1895_v47 }
0x13f6   :  { %v3996_v23 = vpack.c.bf16 %v4129_v52, %v4128_v38  ;;  %3734 = vmatmul.mubr.msk.f32.vlgmr.msra.gmra.mrb[8].mxu0 %vm560_vm13, %v1896_v49  ;;  %v4204_v54 = vpop.eup %4203  ;;  %4011 = vmatprep.subr.bf16.mxu1 %v4010_v22 }
0x13f7   :  { %v2296_v58 = vmul.f32 %v4204_v54, %v4192_v26  ;;  %v3340_v26 = vld [vmem:[%s5049_s10 + $0x38] sm:$0xff]  ;;  %4013 = vmatpush3.bf16.msra.mxu1 %v4010_v22 }
0x13f8   :  { %3997 = vmatprep.subr.bf16.mxu0 %v3996_v23  ;;  %v4014_v28 = vpack.c.bf16 %v3340_v26, %v3339_v18  ;;  %v3360_v18 = vld [vmem:[%s5054_s16 + $0x58] sm:$0xff]  ;;  %v3361_v26 = vld [vmem:[%s5054_s16 + $0x60] sm:$0xff] }
0x13f9   :  { %3999 = vmatpush3.bf16.msra.mxu0 %v3996_v23  ;;  %v4030_v22 = vpack.c.bf16 %v3360_v18, %v3359_v9  ;;  %v3371_v9 = vld [vmem:[%s5057_s18 + $0x1] ss:$0 sm:$0xff] }
0x13fa   :  { %v4206_v57 = vpop.eup %4205  ;;  %4002 = vmatprep.subr.msk.bf16.mxu0 %vm4509_vm12, %v4804_v30  ;;  %4015 = vmatprep.subr.bf16.mxu1 %v4014_v28 }
0x13fb   :  { %v2295_v50 = vmul.f32 %v4206_v57, %v4194_v31  ;;  %4017 = vmatpush3.bf16.msra.mxu1 %v4014_v28  ;;  %v3362_v28 = vld [vmem:[%s5054_s16 + $0x68] sm:$0xff] }
0x13fd   :  { %3747 = vmatprep.mubr.msk.f32.mxu0 %vm560_vm13, %v2295_v50 }
0x13fe   :  { %3748 = vmatmul.mubr.msk.f32.vlgmr.msra.gmra.mrb[8].mxu0 %vm560_vm13, %v2296_v58  ;;  %v3350_v58 = vld [vmem:[%s5051_s14 + $0x28] sm:$0xff] }
0x13ff   :  { %3754 = vmatprep.mubr.msk.f32.mxu0 %vm305_vm7, %v2390_v59 }
0x1402   :  { %4005 = vmatpush3.bf16.xpose.msk.msra.mxu0 %vm4509_vm12, %v4804_v30 }
0x1409   :  { %3755 = vmatmul.mubr.msk.f32.vlgmr.msra.gmra.mrb[10].mxu0 %vm305_vm7, %v2391_v48  ;;  %v3351_v48 = vld [vmem:[%s5051_s14 + $0x30] sm:$0xff] }
0x14dc   :  { %v3756_v60 = vpop.f32.mrb[10].mxu0 }
0x14dd   :  { %v2474_v61 = vmul.f32 0.35355338, %v3756_v60  ;;  %v2464_v6 = vpop.f32.mrb[11].mxu0  ;;  %v3352_v60 = vld [vmem:[%s5051_s14 + $0x38] sm:$0xff] }
0x14de   :  { %v2473_v7 = vmul.f32 0.35355338, %v2464_v6 }
0x14df   :  { %v2476_v25 = vadd.f32 %v4227_v55, %v2474_v61  ;;  %v4022_v61 = vpack.c.bf16 %v3352_v60, %v3351_v48 }
0x14e0   :  { %v2475_v37 = vadd.f32 %v4228_v8, %v2473_v7 }
0x14e1   :  { %v2480_v30 = vsel %vm560_vm13, %v2476_v25, -inf }
0x14e2   :  { %2481 = vmax.xlane.f32.xlu0 %v2480_v30  ;;  %v2477_v39 = vsel %vm560_vm13, %v2475_v37, -inf }
0x14e3   :  { %2478 = vmax.xlane.f32.xlu1 %v2477_v39  ;;  %v3347_v39 = vld [vmem:[%s5052_s12 + $0x1] ss:$0 sm:$0xff] }
0x156f   :  { %v2482_v19 = vpop.xlane.xlu0 %2481 }
0x1570   :  { %v2484_v0 = vsub.f32 %v2476_v25, %v2482_v19  ;;  %v2479_v10 = vpop.xlane.xlu1 %2478 }
0x1571   :  { %v2483_v11 = vsub.f32 %v2475_v37, %v2479_v10 }
0x1572   :  { %v2487_v12 = vmul.f32 1.442695, %v2484_v0  ;;  %v3348_v0 = vld [vmem:[%s5053_s13 + $0x1] ss:$0 sm:$0xff] }
0x1573   :  { %v2485_v29 = vmul.f32 1.442695, %v2483_v11 }
0x1574   :  { %4207 = vpow2.f32 %v2487_v12 }
0x1575   :  { %4209 = vpow2.f32 %v2485_v29 }
0x157e   :  { %v4208_v33 = vpop.eup %4207 }
0x157f   :  { %v4210_v13 = vpop.eup %4209  ;;  %v2492_v16 = vsel %vm560_vm13, %v4208_v33, 0.0 }
0x1580   :  { %2493 = vadd.xlane.f32.xlu0 %v2492_v16  ;;  %v2489_v17 = vsel %vm560_vm13, %v4210_v13, 0.0  ;;  %v3357_v16 = vld [vmem:[%s5054_s16 + $0x40] sm:$0xff] }
0x1581   :  { %2490 = vadd.xlane.f32.xlu1 %v2489_v17  ;;  %v3358_v17 = vld [vmem:[%s5054_s16 + $0x48] sm:$0xff] }
0x1582   :  { %v4026_v27 = vpack.c.bf16 %v3358_v17, %v3357_v16 }
0x1592   :  { %4131 = vrot.lane.b32.xlu1 %v4130_v14, %s4232_s27 }
0x160d   :  { %v2494_v3 = vpop.xlane.xlu0 %2493 }
0x160e   :  { %4211 = vrcp.f32 %v2494_v3  ;;  %v2491_v4 = vpop.xlane.xlu1 %2490  ;;  %v4034_v3 = vpack.c.bf16 %v3362_v28, %v3361_v26  ;;  %v3372_v28 = vld [vmem:[%s5058_s19 + $0x1] ss:$0 sm:$0xff] }
0x160f   :  { %4213 = vrcp.f32 %v2491_v4  ;;  %v3363_v4 = vld [vmem:[%s5054_s16 + $0x70] sm:$0xff] }
0x1612   :  { %v4132_v14 = vpop.permute.xlu1 %4131 }
0x1613   :  { %v4134_v31 = vunpack.i.h.bf16 %v4132_v14  ;;  %v4133_v32 = vunpack.i.l.bf16 %v4132_v14  ;;  %v3364_v14 = vld [vmem:[%s5054_s16 + $0x78] sm:$0xff] }
0x1615   :  { %v4006_v56 = vpack.c.bf16 %v4134_v31, %v4133_v32  ;;  %v4038_v31 = vpack.c.bf16 %v3364_v14, %v3363_v4  ;;  %v3354_v32 = vld [vmem:[%s5055_s15 + $0x1] ss:$0 sm:$0xff] }
0x1617   :  { %4007 = vmatprep.subr.bf16.mxu0 %v4006_v56 }
0x1618   :  { %v4212_v34 = vpop.eup %4211  ;;  %4009 = vmatpush3.bf16.msra.mxu0 %v4006_v56 }
0x1619   :  { %v4214_v35 = vpop.eup %4213  ;;  %v2498_v40 = vmul.f32 %v4212_v34, %v4208_v33  ;;  %4027 = vmatprep.subr.bf16.mxu0 %v4026_v27 }
0x161a   :  { %v2497_v36 = vmul.f32 %v4214_v35, %v4210_v13 }
0x161c   :  { %3761 = vmatprep.mubr.msk.f32.mxu0 %vm560_vm13, %v2497_v36 }
0x161d   :  { %3762 = vmatmul.mubr.msk.f32.vlgmr.msra.gmra.mrb[8].mxu0 %vm560_vm13, %v2498_v40 }
0x161e   :  { %4029 = vmatpush3.bf16.msra.mxu0 %v4026_v27  ;;  %v2993_v27 = vshrl.u32 %v81_v20, 7  ;;  %v3072_v20 = vld [vmem:[%s5059_s20 + $0x8] sm:$0xff] }
0x161f   :  { %4031 = vmatprep.subr.bf16.mxu0 %v4030_v22 }
0x1622   :  { %4033 = vmatpush3.bf16.msra.mxu0 %v4030_v22 }
0x1623   :  { %4035 = vmatprep.subr.bf16.mxu0 %v4034_v3 }
0x1626   :  { %4037 = vmatpush3.bf16.msra.mxu0 %v4034_v3  ;;  %v2994_v3 = vmul.u32 8, %v2993_v27 }
0x1627   :  { %4039 = vmatprep.subr.bf16.mxu0 %v4038_v31 }
0x1628   :  { %vm2995_vm6 = vcmp.eq.s32.totalorder %v4403_v21, %v2994_v3  ;;  %v3074_v21 = vld [vmem:[%s5059_s20 + $0x18] sm:$0xff] }
0x162a   :  { %4041 = vmatpush3.bf16.msra.mxu0 %v4038_v31 }
0x16f0   :  { %v3763_v41 = vpop.f32.mrb[8].mxu0 }
0x16f1   :  { %v2581_v42 = vpop.f32.mrb[9].mxu0 }
0x16f2   :  { %3772 = vmatprep.mubr.msk.f32.mxu1 %vm305_vm7, %v2581_v42 }
0x16f3   :  { %3773 = vmatmul.mubr.msk.f32.vlgmr.msra.gmra.mrb[20].mxu1 %vm305_vm7, %v3763_v41 }
0x17c6   :  { %v3774_v62 = vpop.f32.mrb[20].mxu1 }
0x17c7   :  { %v2677_v63 = vpop.f32.mrb[21].mxu1  ;;  %v2683_v15 = vadd.f32 %v3774_v62, %v3342_v43 }
0x17c8   :  { %v2678_v44 = vadd.f32 %v3342_v43, %v2677_v63 }
0x17c9   :  { %v2687_v2 = vadd.f32 %v2683_v15, %v4747_v53  ;;  %v3349_v53 = vld [vmem:[%s5051_s14 + $0x20] sm:$0xff] }
0x17ca   :  { %v2686_v45 = vadd.f32 %v2678_v44, %v4743_v51  ;;  %v4018_v59 = vpack.c.bf16 %v3350_v58, %v3349_v53 }
0x17cb   :  { %v2695_v5 = vsel %vm305_vm7, %v2687_v2, 0.0 }
0x17cc   :  { %v2692_v1 = vsel %vm305_vm7, %v2686_v45, 0.0  ;;  %4019 = vmatprep.subr.bf16.mxu1 %v4018_v59 }
0x17cd   :  { %2693 = vadd.xlane.f32.xlu0 %v2692_v1  ;;  %4021 = vmatpush3.bf16.msra.mxu1 %v4018_v59 }
0x17ce   :  { %4023 = vmatprep.subr.bf16.mxu1 %v4022_v61 }
0x17d1   :  { %2696 = vadd.xlane.f32.xlu0 %v2695_v5  ;;  %4025 = vmatpush3.bf16.msra.mxu1 %v4022_v61 }
0x185a   :  { %v2694_v46 = vpop.xlane.xlu0 %2693 }
0x185b   :  { %v2698_v47 = vmul.f32 0.03125, %v2694_v46 }
0x185d   :  { %v2700_v49 = vsub.f32 %v2686_v45, %v2698_v47 }
0x185e   :  { %v2697_v52 = vpop.xlane.xlu0 %2696 }
0x185f   :  { %v2699_v38 = vmul.f32 0.03125, %v2697_v52  ;;  %v2702_v23 = vmul.f32 %v2700_v49, %v2700_v49 }
0x1861   :  { %v2701_v54 = vsub.f32 %v2687_v2, %v2699_v38  ;;  %v2704_v57 = vsel %vm305_vm7, %v2702_v23, 0.0 }
0x1862   :  { %2705 = vadd.xlane.f32.xlu0 %v2704_v57 }
0x1863   :  { %v2703_v50 = vmul.f32 %v2701_v54, %v2701_v54 }
0x1865   :  { %v2707_v51 = vsel %vm305_vm7, %v2703_v50, 0.0 }
0x1866   :  { %2708 = vadd.xlane.f32.xlu0 %v2707_v51 }
0x18ef   :  { %v2706_v6 = vpop.xlane.xlu0 %2705 }
0x18f0   :  { %v2710_v7 = vmul.f32 0.03125, %v2706_v6 }
0x18f2   :  { %v2712_v55 = vadd.f32 1e-05, %v2710_v7 }
0x18f3   :  { %v2709_v25 = vpop.xlane.xlu0 %2708 }
0x18f4   :  { %4215 = vrsqrt.f32 %v2712_v55  ;;  %v2711_v8 = vmul.f32 0.03125, %v2709_v25 }
0x18f6   :  { %v2713_v37 = vadd.f32 1e-05, %v2711_v8 }
0x18f8   :  { %4217 = vrsqrt.f32 %v2713_v37 }
0x18fe   :  { %v4216_v30 = vpop.eup %4215 }
0x18ff   :  { %v2716_v19 = vmul.f32 %v4216_v30, %v2700_v49 }
0x1901   :  { %v2724_v10 = vmul.f32 %v3347_v39, %v2716_v19 }
0x1902   :  { %v4218_v11 = vpop.eup %4217 }
0x1903   :  { %v2717_v12 = vmul.f32 %v4218_v11, %v2701_v54  ;;  %v2732_v29 = vadd.f32 %v3348_v0, %v2724_v10  ;;  %v3366_v54 = vld [vmem:[%s5056_s17 + $0x1] ss:$0 sm:$0xff] }
0x1905   :  { %v2725_v33 = vmul.f32 %v3347_v39, %v2717_v12  ;;  %3783 = vmatprep.mubr.msk.f32.mxu1 %vm305_vm7, %v2732_v29 }
0x1907   :  { %v2733_v13 = vadd.f32 %v3348_v0, %v2725_v33  ;;  %v4233_v0 = vmov 0.0|0.0  }
0x1908   :  { %4042 = vmatprep.subr.bf16.mxu1 %v4233_v0  ;;  %4051 = vmatprep.subr.bf16.mxu0 %v4233_v0 }
0x1909   :  { %3784 = vmatmul.mubr.msk.f32.vlgmr.msra.gmra.mrb[22].mxu1 %vm305_vm7, %v2733_v13 }
0x190a   :  { %3809 = vmatprep.mubr.msk.f32.mxu1 %vm4234_vm5, %v4230_v24 }
0x19dc   :  { %v3785_v56 = vpop.f32.mrb[22].mxu1 }
0x19dd   :  { %v2825_v34 = vadd.f32 %v3785_v56, %v3354_v32  ;;  %v2819_v35 = vpop.f32.mrb[23].mxu1 }
0x19de   :  { %v2820_v36 = vadd.f32 %v3354_v32, %v2819_v35  ;;  %v3071_v32 = vld [vmem:[%s5059_s20] sm:$0xff] }
0x19df   :  { %v2831_v40 = vmul.f32 0.044715, %v2825_v34  ;;  %v2829_v52 = vmul.f32 0.5, %v2825_v34  ;;  %v4046_v35 = vpack.c.bf16 %v3072_v20, %v3071_v32 }
0x19e0   :  { %v2830_v41 = vmul.f32 0.044715, %v2820_v36  ;;  %v2828_v47 = vmul.f32 0.5, %v2820_v36 }
0x19e1   :  { %v2833_v42 = vmul.f32 %v2831_v40, %v2825_v34 }
0x19e2   :  { %v2832_v43 = vmul.f32 %v2830_v41, %v2820_v36  ;;  %v3156_v41 = vld [vmem:[%s5060_s22] sm:$0xff] }
0x19e3   :  { %v2835_v62 = vmul.f32 %v2833_v42, %v2825_v34  ;;  %v3157_v42 = vld [vmem:[%s5060_s22 + $0x8] sm:$0xff] }
0x19e4   :  { %v2834_v63 = vmul.f32 %v2832_v43, %v2820_v36  ;;  %v3158_v43 = vld [vmem:[%s5060_s22 + $0x10] sm:$0xff] }
0x19e5   :  { %v2837_v15 = vadd.f32 %v2835_v62, %v2825_v34  ;;  %v3373_v34 = vsel %vm2995_vm6, 1.0, %v4230_v24  ;;  %v4052_v62 = vpack.c.bf16 %v3157_v42, %v3156_v41 }
0x19e6   :  { %v2836_v44 = vadd.f32 %v2834_v63, %v2820_v36  ;;  %v3073_v36 = vld [vmem:[%s5059_s20 + $0x10] sm:$0xff]  ;;  %v3159_v63 = vld [vmem:[%s5060_s22 + $0x18] sm:$0xff] }
0x19e7   :  { %v2839_v45 = vmul.f32 0.7978846, %v2837_v15  ;;  %v4049_v40 = vpack.c.bf16 %v3074_v21, %v3073_v36  ;;  %v3160_v15 = vld [vmem:[%s5060_s22 + $0x20] sm:$0xff] }
0x19e8   :  { %v2838_v1 = vmul.f32 0.7978846, %v2836_v44  ;;  %v3161_v44 = vld [vmem:[%s5060_s22 + $0x28] sm:$0xff] }
0x19e9   :  { %4219 = vtanh.f32 %v2839_v45  ;;  %v4058_v45 = vpack.c.bf16 %v3161_v44, %v3160_v15 }
0x19ea   :  { %4221 = vtanh.f32 %v2838_v1 }
0x19f3   :  { %v4220_v2 = vpop.eup %4219 }
0x19f4   :  { %v4222_v5 = vpop.eup %4221  ;;  %v2843_v46 = vadd.f32 1.0, %v4220_v2 }
0x19f5   :  { %v2842_v49 = vadd.f32 1.0, %v4222_v5  ;;  %v3162_v5 = vld [vmem:[%s5060_s22 + $0x30] sm:$0xff] }
0x19f6   :  { %v2845_v23 = vmul.f32 %v2843_v46, %v2829_v52  ;;  %v3163_v46 = vld [vmem:[%s5060_s22 + $0x38] sm:$0xff] }
0x19f7   :  { %v2844_v38 = vmul.f32 %v2842_v49, %v2828_v47  ;;  %v4061_v47 = vpack.c.bf16 %v3163_v46, %v3162_v5  ;;  %v3375_v49 = vld [vmem:[%s5061_s21] ss:$0 sm:$0xff] }
0x19f9   :  { %3802 = vmatprep.mubr.msk.f32.mxu0 %vm128_vm0, %v2844_v38 }
0x19fa   :  { %3803 = vmatmul.mubr.msk.f32.vlgmr.msra.gmra.mrb[12].mxu0 %vm128_vm0, %v2845_v23 }
0x19fb   :  { %3839 = vmatprep.mubr.msk.f32.mxu0 %vm4234_vm5, %v4230_v24  ;;  %4053 = vmatpush3.bf16.msra.mxu0 %v4052_v62 }
0x19fc   :  { %4054 = vmatprep.subr.bf16.mxu0 %v4233_v0 }
0x1acd   :  { %v3804_v57 = vpop.f32.mrb[12].mxu0 }
0x1ace   :  { %v2941_v50 = vadd.f32 %v3804_v57, %v3366_v54  ;;  %v2935_v51 = vpop.f32.mrb[13].mxu0  ;;  %v3377_v57 = vld [vmem:[%s5062_s23] ss:$0 sm:$0xff] }
0x1acf   :  { %v2936_v53 = vadd.f32 %v3366_v54, %v2935_v51 }
0x1ad0   :  { %v2945_v58 = vadd.f32 %v2941_v50, %v2733_v13 }
0x1ad1   :  { %v2944_v59 = vadd.f32 %v2936_v53, %v2732_v29 }
0x1ad2   :  { %v2953_v48 = vsel %vm305_vm7, %v2945_v58, 0.0 }
0x1ad3   :  { %2954 = vadd.xlane.f32.xlu0 %v2953_v48  ;;  %v2950_v60 = vsel %vm305_vm7, %v2944_v59, 0.0 }
0x1ad4   :  { %2951 = vadd.xlane.f32.xlu1 %v2950_v60 }
0x1b60   :  { %v2955_v61 = vpop.xlane.xlu0 %2954 }
0x1b61   :  { %v2957_v6 = vmul.f32 0.03125, %v2955_v61  ;;  %v2952_v7 = vpop.xlane.xlu1 %2951 }
0x1b62   :  { %v2956_v55 = vmul.f32 0.03125, %v2952_v7 }
0x1b63   :  { %v2959_v25 = vsub.f32 %v2945_v58, %v2957_v6 }
0x1b64   :  { %v2958_v8 = vsub.f32 %v2944_v59, %v2956_v55 }
0x1b65   :  { %v2961_v39 = vmul.f32 %v2959_v25, %v2959_v25 }
0x1b66   :  { %v2960_v37 = vmul.f32 %v2958_v8, %v2958_v8 }
0x1b67   :  { %v2965_v19 = vsel %vm305_vm7, %v2961_v39, 0.0 }
0x1b68   :  { %v2962_v30 = vsel %vm305_vm7, %v2960_v37, 0.0 }
0x1b69   :  { %2963 = vadd.xlane.f32.xlu0 %v2962_v30 }
0x1b6d   :  { %2966 = vadd.xlane.f32.xlu0 %v2965_v19 }
0x1bf6   :  { %v2964_v10 = vpop.xlane.xlu0 %2963 }
0x1bf7   :  { %v2968_v11 = vmul.f32 0.03125, %v2964_v10 }
0x1bf9   :  { %v2970_v12 = vadd.f32 1e-05, %v2968_v11 }
0x1bfa   :  { %v2967_v29 = vpop.xlane.xlu0 %2966 }
0x1bfb   :  { %4223 = vrsqrt.f32 %v2970_v12  ;;  %v2969_v33 = vmul.f32 0.03125, %v2967_v29 }
0x1bfd   :  { %v2971_v13 = vadd.f32 1e-05, %v2969_v33 }
0x1bff   :  { %4225 = vrsqrt.f32 %v2971_v13 }
0x1c05   :  { %v4224_v16 = vpop.eup %4223 }
0x1c06   :  { %v2974_v17 = vmul.f32 %v4224_v16, %v2958_v8 }
0x1c08   :  { %v2982_v26 = vmul.f32 %v3371_v9, %v2974_v17 }
0x1c09   :  { %v4226_v18 = vpop.eup %4225 }
0x1c0a   :  { %v2975_v22 = vmul.f32 %v4226_v18, %v2959_v25  ;;  %v2990_v14 = vadd.f32 %v3372_v28, %v2982_v26 }
0x1c0c   :  { %v2983_v4 = vmul.f32 %v3371_v9, %v2975_v22 }
0x1c0e   :  { %v2991_v31 = vadd.f32 %v3372_v28, %v2983_v4 }
0x1c10   :  { %v4043_v56 = vpack.c.bf16 %v2991_v31, %v2990_v14 }
0x1c12   :  { %4044 = vmatpush3.bf16.msra.mxu1 %v4043_v56 }
0x1c13   :  { %4045 = vmatprep.subr.bf16.mxu1 %v4233_v0 }
0x1c15   :  { %3810 = vmatmul.mubr.msk.f32.vlgmr.msra.gmra.mrb[24].mxu1 %vm560_vm13, %v3373_v34 }
0x1c16   :  { %4047 = vmatpush3.bf16.msra.mxu1 %v4046_v35  ;;  %3820 = vmatprep.mubr.msk.f32.mxu1 %vm4234_vm5, %v4230_v24  ;;  %v4055_v24 = vpack.c.bf16 %v3159_v63, %v3158_v43 }
0x1c17   :  { %4048 = vmatprep.subr.bf16.mxu1 %v4233_v0 }
0x1c18   :  { %4056 = vmatpush3.bf16.msra.mxu0 %v4055_v24 }
0x1c19   :  { %4057 = vmatprep.subr.bf16.mxu0 %v4233_v0 }
0x1c1a   :  { %4050 = vmatpush3.bf16.msra.mxu1 %v4049_v40 }
0x1c1c   :  { %4059 = vmatpush3.bf16.msra.mxu0 %v4058_v45 }
0x1c1d   :  { %4060 = vmatprep.subr.bf16.mxu0 %v4233_v0 }
0x1c20   :  { %4062 = vmatpush3.bf16.msra.mxu0 %v4061_v47 }
0x1ce8   :  { %v3067_v1 = vpop.f32.mrb[24].mxu1 }
0x1ce9   :  { %v3811_v2 = vpop.f32.mrb[25].mxu1  ;;  %3821 = vmatmul.mubr.msk.f32.vlgmr.msra.gmra.mrb[26].mxu1 %vm305_vm7, %v3067_v1 }
0x1dbc   :  { %v3151_v52 = vpop.f32.mrb[26].mxu1 }
0x1dbd   :  { %v3152_v38 = vadd.f32 %v3375_v49, %v3151_v52  ;;  %v3822_v23 = vpop.f32.mrb[27].mxu1 }
0x1dbf   :  { %v3155_v54 = vmax.f32 %v3152_v38, 0.0 }
0x1dc1   :  { %3840 = vmatmul.mubr.msk.f32.vlgmr.msra.gmra.mrb[14].mxu0 %vm128_vm0, %v3155_v54 }
0x1e94   :  { %v3240_v50 = vpop.f32.mrb[14].mxu0 }
0x1e95   :  { %v3241_v51 = vadd.f32 %v3377_v57, %v3240_v50  ;;  %v3841_v53 = vpop.f32.mrb[15].mxu0 }
0x1e97   :  { %3244 = vst [vmem:[%s5063_s24] sm:$0xff] %v3241_v51 }

</bundles_post_ra>
